<compile_context>
chip_gen: v6e
topology: v6e:2x2x1
jax: 0.10.0
libtpu: 0.0.40
codegen_flags: <defaults>
</compile_context>

<pallas_src>
import functools

import jax
import jax.numpy as jnp
from jax import lax
from jax.experimental import pallas as pl
from jax.experimental.pallas import tpu as pltpu

HOR_IN = 14                      # hor_in hardcoded by the module
HP = 16                          # hor padded up to a multiple of 8
BN_EPS = 1e-5


def _round_up(n, m):
    return ((n + m - 1) // m) * m


def _is_v5e():
    """The recompute-in-kernel-B restructure wins on v6e/v7x (HBM-bound) but
    not on v5e (much slower MXU) -> pick the stored-intermediate path there."""
    try:
        kind = jax.devices()[0].device_kind.lower()
    except Exception:
        return False
    return ("v5 lite" in kind) or ("v5e" in kind) or ("v5lite" in kind)


# ---------------------------------------------------------------------------
# Shared in-kernel helpers.
# ---------------------------------------------------------------------------
def _two_stage(x, c0, b0, c1, b1):
    """Both fused VerHorMat stages.  Matmul operands keep the weights' dtype
    (bf16 in the default mode); accumulation and elementwise math are f32."""
    u0 = jnp.dot(x, c0, preferred_element_type=jnp.float32) + b0
    x0 = jnp.maximum(u0, 0.0)                                   # (TM, nf) f32
    z = jnp.dot(x0.astype(c1.dtype), c1,
                preferred_element_type=jnp.float32) + b1        # (TM, nf) f32
    return x0, z


def _tile_stats(z, *, tile_m, m_valid, mask_rows):
    """Per-tile, per-lane (sum, tile-mean-centered sum-of-squares) of the BN
    input.  Centering per tile keeps the later variance combine numerically
    safe.  Padded rows of the last tile are excluded from the statistics."""
    if mask_rows:
        pid = pl.program_id(0)
        rows = lax.broadcasted_iota(jnp.int32, (tile_m, 1), 0)
        valid = (pid * tile_m + rows) < m_valid
        zs = jnp.where(valid, z, 0.0)
        n_valid = jnp.minimum(tile_m, m_valid - pid * tile_m).astype(jnp.float32)
    else:
        valid = None
        zs = z
        n_valid = jnp.float32(tile_m)
    s1 = jnp.sum(zs, axis=0, keepdims=True)                     # (1, nf)
    mu = s1 * (1.0 / n_valid)
    dev = z - mu
    if mask_rows:
        dev = jnp.where(valid, dev, 0.0)
    s2 = jnp.sum(dev * dev, axis=0, keepdims=True)              # (1, nf)
    return s1, s2


def _pack_stats(s1, s2):
    """Pack sum / centered sum-of-squares into one (8, nf) output block."""
    pad = jnp.zeros((6, s1.shape[1]), jnp.float32)
    return jnp.concatenate([s1, s2, pad], axis=0)


def _bn_blend(x0, z, aff, out_lanes):
    """Folded BatchNorm affine + ReLU + a/(1-a) blend; compact-lane slice."""
    scale = aff[0:1, :]
    shift = aff[1:2, :]
    a = aff[2:3, :]
    x1 = jnp.maximum(z * scale + shift, 0.0)
    y = a * x0 + (1.0 - a) * x1
    return y[:, :out_lanes]


# ---------------------------------------------------------------------------
# Kernel bodies.
# ---------------------------------------------------------------------------
def _stats_only_kernel(x_ref, c0_ref, b0_ref, c1_ref, b1_ref, stats_ref,
                       *, tile_m, m_valid, mask_rows):
    """Recompute variant, pass 1: matmuls + ReLU, emit only BN statistics."""
    _, z = _two_stage(x_ref[...], c0_ref[...], b0_ref[...],
                      c1_ref[...], b1_ref[...])
    s1, s2 = _tile_stats(z, tile_m=tile_m, m_valid=m_valid, mask_rows=mask_rows)
    stats_ref[...] = _pack_stats(s1, s2)


def _recompute_bn_blend_kernel(x_ref, c0_ref, b0_ref, c1_ref, b1_ref, aff_ref,
                               out_ref, *, out_lanes):
    """Recompute variant, pass 2: redo the matmuls, then BN + ReLU + blend."""
    x0, z = _two_stage(x_ref[...], c0_ref[...], b0_ref[...],
                       c1_ref[...], b1_ref[...])
    out_ref[...] = _bn_blend(x0, z, aff_ref[...], out_lanes).astype(out_ref.dtype)


def _store_stages_kernel(x_ref, c0_ref, b0_ref, c1_ref, b1_ref,
                         x0_ref, z_ref, stats_ref,
                         *, tile_m, m_valid, mask_rows):
    """Store variant (v5e), pass 1: matmuls + ReLU, stash x0/z (bf16 storage)
    and emit BN statistics computed from the f32 z (before any downcast)."""
    x0, z = _two_stage(x_ref[...], c0_ref[...], b0_ref[...],
                       c1_ref[...], b1_ref[...])
    x0_ref[...] = x0.astype(x0_ref.dtype)
    z_ref[...] = z.astype(z_ref.dtype)
    s1, s2 = _tile_stats(z, tile_m=tile_m, m_valid=m_valid, mask_rows=mask_rows)
    stats_ref[...] = _pack_stats(s1, s2)


def _stored_bn_blend_kernel(x0_ref, z_ref, aff_ref, out_ref, *, out_lanes):
    """Store variant, pass 2: BN + ReLU + blend from stored intermediates
    (upcast at the ref boundary; all arithmetic in f32)."""
    x0 = x0_ref[...].astype(jnp.float32)
    z = z_ref[...].astype(jnp.float32)
    out_ref[...] = _bn_blend(x0, z, aff_ref[...], out_lanes).astype(out_ref.dtype)


# ---------------------------------------------------------------------------
# Wrapper.
# ---------------------------------------------------------------------------
def separable_part1(x, params, *, tile_m=1024, precision="bf16",
                    recompute=None, vmem_limit_bytes=48 * 1024 * 1024):
    """SeparablePart1 forward. x: (M, 14, patch_numel) f32 -> (M, 14, ver) f32.

    precision: "bf16" (default: bf16 MXU operands / stored intermediates,
               f32 accumulation + elementwise) or "f32" (exact).
    recompute: True  -> kernel B re-reads x and redoes the matmuls (no x0/z
                        HBM round trip; best on v6e/v7x),
               False -> kernel A stores x0/z intermediates (best on v5e),
               None  -> pick automatically from the attached device.
    """
    if recompute is None:
        recompute = not _is_v5e()
    mm_dtype = jnp.bfloat16 if precision == "bf16" else jnp.float32

    m, hor_in, p_in = x.shape
    assert hor_in == HOR_IN
    wv0, wh0 = params['wv0'], params['wh0']        # (P, V), (14, H)
    wv1, wh1 = params['wv1'], params['wh1']        # (V, V), (14, H)
    b0, b1 = params['b0'], params['b1']            # (H, V)
    v = wv0.shape[1]
    hor = wh0.shape[1]
    assert hor == HOR_IN, "stage-1 hor_in is hardcoded to 14 in the module"
    gamma = params['gamma'].reshape(hor)
    beta = params['beta'].reshape(hor)
    a_val = params['a'].reshape(())

    nf = HP * v                   # fused (padded hor, ver) lane width, e.g. 512
    in_f = HOR_IN * p_in          # flattened input lane width, e.g. 448
    out_f = HOR_IN * v            # flattened output lane width, e.g. 448

    # Zero-pad the hor maps 14 -> 16 so padded channels come out exactly 0.
    wh0_p = jnp.zeros((HOR_IN, HP), jnp.float32).at[:, :hor].set(wh0)
    wh1_p = jnp.zeros((HP, HP), jnp.float32).at[:HOR_IN, :hor].set(wh1)

    # Fold ver∘hor of each (purely linear) VerHorMat into one dense matrix:
    #   u[m, k*V + w] = sum_{h, p} x[m, h*P + p] * Wh[h, k] * Wv[p, w]
    c0 = jnp.kron(wh0_p, wv0).astype(mm_dtype)     # (14*P, HP*V)
    c1 = jnp.kron(wh1_p, wv1).astype(mm_dtype)     # (HP*V, HP*V)

    def flat_bias(b):                              # (H, V) -> (1, HP*V), zero-padded
        return jnp.zeros((HP, v), jnp.float32).at[:hor, :].set(b).reshape(1, nf)

    b0_f, b1_f = flat_bias(b0), flat_bias(b1)

    # Row tiling (reshape is free for a row-major input).  NOTE: on v7x, pick
    # tile_m so that the number of tiles is even to keep both TensorCores busy.
    x2 = x.reshape(m, in_f).astype(mm_dtype)
    tm = tile_m if m >= tile_m else _round_up(m, 8)
    m_pad = _round_up(m, tm)
    if m_pad != m:
        x2 = jnp.pad(x2, ((0, m_pad - m), (0, 0)))
    n_tiles = m_pad // tm
    mask_rows = (m_pad != m)

    cparams = pltpu.CompilerParams(dimension_semantics=("parallel",),
                                   vmem_limit_bytes=vmem_limit_bytes)

    def resident(shape):
        # Grid-invariant operand: single-buffer it (frees VMEM for row tiles).
        try:
            return pl.BlockSpec(shape, lambda i: (0,) * len(shape),
                                pipeline_mode=pl.Buffered(1))
        except Exception:
            return pl.BlockSpec(shape, lambda i: (0,) * len(shape))

    x_spec = pl.BlockSpec((tm, in_f), lambda i: (i, 0))
    stats_spec = pl.BlockSpec((8, nf), lambda i: (i, 0))
    weight_specs = [resident((in_f, nf)), resident((1, nf)),
                    resident((nf, nf)), resident((1, nf))]

    # ---- pass 1: matmuls (+ optional intermediate store) + BN statistics ----
    if recompute:
        kernel_a = functools.partial(_stats_only_kernel, tile_m=tm,
                                     m_valid=m, mask_rows=mask_rows)
        stats_t = pl.pallas_call(
            kernel_a,
            grid=(n_tiles,),
            in_specs=[x_spec] + weight_specs,
            out_specs=stats_spec,
            out_shape=jax.ShapeDtypeStruct((n_tiles * 8, nf), jnp.float32),
            compiler_params=cparams,
        )(x2, c0, b0_f, c1, b1_f)
        x0_f = z_f = None
    else:
        inter_dtype = mm_dtype      # bf16 storage halves the x0/z round trip
        kernel_a = functools.partial(_store_stages_kernel, tile_m=tm,
                                     m_valid=m, mask_rows=mask_rows)
        x0_f, z_f, stats_t = pl.pallas_call(
            kernel_a,
            grid=(n_tiles,),
            in_specs=[x_spec] + weight_specs,
            out_specs=[
                pl.BlockSpec((tm, nf), lambda i: (i, 0)),
                pl.BlockSpec((tm, nf), lambda i: (i, 0)),
                stats_spec,
            ],
            out_shape=[
                jax.ShapeDtypeStruct((m_pad, nf), inter_dtype),
                jax.ShapeDtypeStruct((m_pad, nf), inter_dtype),
                jax.ShapeDtypeStruct((n_tiles * 8, nf), jnp.float32),
            ],
            compiler_params=cparams,
        )(x2, c0, b0_f, c1, b1_f)

    # ---- tiny glue: merge per-tile (sum, centered sumsq) -> per-channel BN ----
    stats = stats_t.reshape(n_tiles, 8, nf)
    s1_t = stats[:, 0, :]                                      # (T, nf)
    s2_t = stats[:, 1, :]
    n_last = m - (n_tiles - 1) * tm
    n_t = jnp.full((n_tiles,), float(tm), jnp.float32).at[-1].set(float(n_last))
    mu_t = s1_t / n_t[:, None]                                 # per-tile lane means
    mu_lane = jnp.sum(s1_t, axis=0) / jnp.float32(m)           # (nf,)
    m2_lane = jnp.sum(s2_t + n_t[:, None] * (mu_t - mu_lane) ** 2, axis=0)
    mu_ch = mu_lane.reshape(HP, v)
    mean_c = jnp.mean(mu_ch, axis=1)                           # (HP,)
    var_c = jnp.mean(m2_lane.reshape(HP, v) / jnp.float32(m)
                     + (mu_ch - mean_c[:, None]) ** 2, axis=1)  # biased variance
    var_c = jnp.maximum(var_c, 0.0)

    gamma_p = jnp.zeros((HP,), jnp.float32).at[:hor].set(gamma)
    beta_p = jnp.zeros((HP,), jnp.float32).at[:hor].set(beta)
    scale_c = gamma_p * lax.rsqrt(var_c + BN_EPS)
    shift_c = beta_p - mean_c * scale_c
    # Pack folded BN affine + blend coefficient into ONE (8, nf) operand.
    aff = (jnp.zeros((8, nf), jnp.float32)
           .at[0].set(jnp.repeat(scale_c, v))
           .at[1].set(jnp.repeat(shift_c, v))
           .at[2].set(jnp.full((nf,), a_val, jnp.float32)))

    # ---- pass 2: BN + ReLU + blend (recompute or read stored intermediates) --
    out_spec = pl.BlockSpec((tm, out_f), lambda i: (i, 0))
    out_shape = jax.ShapeDtypeStruct((m_pad, out_f), jnp.float32)

    if recompute:
        kernel_b = functools.partial(_recompute_bn_blend_kernel, out_lanes=out_f)
        out_flat = pl.pallas_call(
            kernel_b,
            grid=(n_tiles,),
            in_specs=[x_spec] + weight_specs + [resident((8, nf))],
            out_specs=out_spec,
            out_shape=out_shape,
            compiler_params=cparams,
        )(x2, c0, b0_f, c1, b1_f, aff)
    else:
        kernel_b = functools.partial(_stored_bn_blend_kernel, out_lanes=out_f)
        out_flat = pl.pallas_call(
            kernel_b,
            grid=(n_tiles,),
            in_specs=[
                pl.BlockSpec((tm, nf), lambda i: (i, 0)),
                pl.BlockSpec((tm, nf), lambda i: (i, 0)),
                resident((8, nf)),
            ],
            out_specs=out_spec,
            out_shape=out_shape,
            compiler_params=cparams,
        )(x0_f, z_f, aff)

    return out_flat[:m].reshape(m, HOR_IN, v)


# ---------------------------------------------------------------------------
# Pure-JAX reference and synthetic parameters.
# ---------------------------------------------------------------------------
def separable_part1_ref(x, p):
    """Identical math to the PyTorch module (training-mode BatchNorm)."""
    t0 = jnp.einsum('mhp,pv->mhv', x, p['wv0'])
    u0 = jnp.einsum('mhv,hk->mkv', t0, p['wh0'])
    x0 = jnp.maximum(u0 + p['b0'], 0.0)
    t1 = jnp.einsum('mhv,vw->mhw', x0, p['wv1'])
    u1 = jnp.einsum('mhv,hk->mkv', t1, p['wh1'])
    z = u1 + p['b1']
    mean = jnp.mean(z, axis=(0, 2), keepdims=True)
    var = jnp.mean((z - mean) ** 2, axis=(0, 2), keepdims=True)
    zn = (z - mean) / jnp.sqrt(var + BN_EPS) * p['gamma'] + p['beta']
    x1 = jnp.maximum(zn, 0.0)
    a = p['a'][0, 0]
    return a * x0 + (1.0 - a) * x1


def make_params(key, patch_numel, ver_size, hor_size, hor_in=14):
    """Deterministic synthetic parameters matching the module's shapes.
    Linear weights are stored pre-transposed: (in, out)."""
    ks = jax.random.split(key, 6)
    gain = jnp.sqrt(2.0)  # nn.init.calculate_gain('relu')

    def lin(k, n_in, n_out):          # ~ kaiming-uniform-ish, deterministic
        bound = 1.0 / jnp.sqrt(jnp.float32(n_in))
        return jax.random.uniform(k, (n_in, n_out), jnp.float32, -bound, bound)

    def xavier(k, h_out, v_out):      # nn.init.xavier_normal_ with relu gain
        std = gain * jnp.sqrt(2.0 / jnp.float32(h_out + v_out))
        return std * jax.random.normal(k, (h_out, v_out), jnp.float32)

    return {
        'a': jnp.zeros((1, 1), jnp.float32),                 # torch.tensor((0,))
        'wv0': lin(ks[0], patch_numel, ver_size),            # ver0.weight.T
        'wh0': lin(ks[1], hor_in, hor_size),                 # hor0.weight.T
        'b0': xavier(ks[2], hor_size, ver_size),
        'wv1': lin(ks[3], ver_size, ver_size),               # ver1.weight.T
        'wh1': lin(ks[4], hor_in, hor_size),                 # hor1.weight.T
        'b1': xavier(ks[5], hor_size, ver_size),
        # BatchNorm2d(hor_size) affine params, PyTorch default init:
        'gamma': jnp.ones((1, hor_size, 1), jnp.float32),
        'beta': jnp.zeros((1, hor_size, 1), jnp.float32),
    }


if __name__ == "__main__":
    # Small shapes consistent with the module (non-small network hardcodes
    # hor_in=14 for the second stage, so hor_size must be 14).
    B, N = 2, 8               # batch, patches-per-image
    PATCH_NUMEL = 32          # ver_in of stage 0
    VER_SIZE = 32
    HOR_SIZE = 14

    key = jax.random.PRNGKey(0)
    kx, kp = jax.random.split(key)
    params = make_params(kp, PATCH_NUMEL, VER_SIZE, HOR_SIZE)

    x4d = jax.random.normal(kx, (B, N, 14, PATCH_NUMEL), jnp.float32)
    x = x4d.reshape(B * N, 14, PATCH_NUMEL)   # flatten leading dims -> M rows

    ref = separable_part1_ref(x, params)

    # Exact (f32) mode: both pipeline variants, tight tolerance.
    for rec in (False, True):
        out32 = jax.block_until_ready(
            separable_part1(x, params, precision="f32", recompute=rec))
        assert out32.shape == (B * N, HOR_SIZE, VER_SIZE)
        assert jnp.allclose(out32, ref, rtol=1e-4, atol=1e-4), \
            f"f32 mismatch vs reference (recompute={rec})"

    # Default performance mode: bf16 MXU operands, f32 accumulation/elementwise
    # (looser tolerance accounts for bf16 operand rounding).
    out = jax.block_until_ready(separable_part1(x, params))
    assert out.shape == (B * N, HOR_SIZE, VER_SIZE)
    assert jnp.allclose(out, ref, rtol=1e-1, atol=1e-1), \
        "bf16 mismatch vs reference"

    print("KERNEL_OK")
</pallas_src>

<mosaic_0001>
module attributes {stable_mosaic.version = 11 : i64} {
  func.func @_store_stages_kernel(%arg0: i32, %arg1: memref<16x448xf32, #tpu.memory_space<vmem>>, %arg2: memref<448x512xf32, #tpu.memory_space<vmem>>, %arg3: memref<1x512xf32, #tpu.memory_space<vmem>>, %arg4: memref<512x512xf32, #tpu.memory_space<vmem>>, %arg5: memref<1x512xf32, #tpu.memory_space<vmem>>, %arg6: memref<16x512xf32, #tpu.memory_space<vmem>>, %arg7: memref<16x512xf32, #tpu.memory_space<vmem>>, %arg8: memref<8x512xf32, #tpu.memory_space<vmem>>) attributes {dimension_semantics = [#tpu.dimension_semantics<parallel>], iteration_bounds = array<i64: 1>, scalar_prefetch = 0 : i64, scratch_operands = 0 : i64, tpu.core_type = #tpu.core_type<tc>, window_params = [{transform_indices = @transform_0, window_bounds = array<i64: 16, 448>}, {pipeline_mode = #tpu.pipeline_mode<synchronous>, transform_indices = @transform_1, window_bounds = array<i64: 448, 512>}, {pipeline_mode = #tpu.pipeline_mode<synchronous>, transform_indices = @transform_2, window_bounds = array<i64: 1, 512>}, {pipeline_mode = #tpu.pipeline_mode<synchronous>, transform_indices = @transform_3, window_bounds = array<i64: 512, 512>}, {pipeline_mode = #tpu.pipeline_mode<synchronous>, transform_indices = @transform_4, window_bounds = array<i64: 1, 512>}, {transform_indices = @transform_5, window_bounds = array<i64: 16, 512>}, {transform_indices = @transform_6, window_bounds = array<i64: 16, 512>}, {transform_indices = @transform_7, window_bounds = array<i64: 8, 512>}]} {
    %c0 = arith.constant 0 : index
    %c0_0 = arith.constant 0 : index
    %0 = vector.load %arg1[%c0, %c0_0] : memref<16x448xf32, #tpu.memory_space<vmem>>, vector<16x448xf32>
    %c0_1 = arith.constant 0 : index
    %c0_2 = arith.constant 0 : index
    %1 = vector.load %arg2[%c0_1, %c0_2] : memref<448x512xf32, #tpu.memory_space<vmem>>, vector<448x512xf32>
    %c0_3 = arith.constant 0 : index
    %c0_4 = arith.constant 0 : index
    %2 = vector.load %arg3[%c0_3, %c0_4] : memref<1x512xf32, #tpu.memory_space<vmem>>, vector<1x512xf32>
    %c0_5 = arith.constant 0 : index
    %c0_6 = arith.constant 0 : index
    %3 = vector.load %arg4[%c0_5, %c0_6] : memref<512x512xf32, #tpu.memory_space<vmem>>, vector<512x512xf32>
    %c0_7 = arith.constant 0 : index
    %c0_8 = arith.constant 0 : index
    %4 = vector.load %arg5[%c0_7, %c0_8] : memref<1x512xf32, #tpu.memory_space<vmem>>, vector<1x512xf32>
    %cst = arith.constant dense<0.000000e+00> : vector<16x512xf32>
    %5 = tpu.matmul %0, %1, %cst {dimension_numbers = #tpu.dot_dimension_numbers<[1], [0], [0], [1], [0, 0, 1, 1], [], []>} : vector<16x448xf32>, vector<448x512xf32>, vector<16x512xf32> -> vector<16x512xf32>
    %6 = vector.broadcast %2 : vector<1x512xf32> to vector<16x512xf32>
    %7 = arith.addf %5, %6 : vector<16x512xf32>
    %cst_9 = arith.constant 0.000000e+00 : f32
    %8 = vector.broadcast %cst_9 : f32 to vector<16x512xf32>
    %9 = arith.maximumf %7, %8 : vector<16x512xf32>
    %cst_10 = arith.constant dense<0.000000e+00> : vector<16x512xf32>
    %10 = tpu.matmul %9, %3, %cst_10 {dimension_numbers = #tpu.dot_dimension_numbers<[1], [0], [0], [1], [0, 0, 1, 1], [], []>} : vector<16x512xf32>, vector<512x512xf32>, vector<16x512xf32> -> vector<16x512xf32>
    %11 = vector.broadcast %4 : vector<1x512xf32> to vector<16x512xf32>
    %12 = arith.addf %10, %11 : vector<16x512xf32>
    %c0_11 = arith.constant 0 : index
    %c0_12 = arith.constant 0 : index
    %13 = vector.load %arg6[%c0_11, %c0_12] : memref<16x512xf32, #tpu.memory_space<vmem>>, vector<16x512xf32>
    tpu.vector_store %arg6[%c0_11, %c0_12], %9 {strides = array<i32>} : memref<16x512xf32, #tpu.memory_space<vmem>>, vector<16x512xf32>,
    %c0_13 = arith.constant 0 : index
    %c0_14 = arith.constant 0 : index
    %14 = vector.load %arg7[%c0_13, %c0_14] : memref<16x512xf32, #tpu.memory_space<vmem>>, vector<16x512xf32>
    tpu.vector_store %arg7[%c0_13, %c0_14], %12 {strides = array<i32>} : memref<16x512xf32, #tpu.memory_space<vmem>>, vector<16x512xf32>,
    %cst_15 = arith.constant dense<0.000000e+00> : vector<512xf32>
    %15 = vector.multi_reduction <add>, %12, %cst_15 [0] : vector<16x512xf32> to vector<512xf32>
    %16 = vector.shape_cast %15 : vector<512xf32> to vector<1x512xf32>
    %cst_16 = arith.constant 1.000000e+00 : f32
    %cst_17 = arith.constant 1.600000e+01 : f32
    %17 = arith.divf %cst_16, %cst_17 : f32
    %18 = vector.broadcast %17 : f32 to vector<1x512xf32>
    %19 = arith.mulf %16, %18 : vector<1x512xf32>
    %20 = vector.broadcast %19 : vector<1x512xf32> to vector<16x512xf32>
    %21 = arith.subf %12, %20 : vector<16x512xf32>
    %22 = arith.mulf %21, %21 : vector<16x512xf32>
    %cst_18 = arith.constant dense<0.000000e+00> : vector<512xf32>
    %23 = vector.multi_reduction <add>, %22, %cst_18 [0] : vector<16x512xf32> to vector<512xf32>
    %24 = vector.shape_cast %23 : vector<512xf32> to vector<1x512xf32>
    %cst_19 = arith.constant 0.000000e+00 : f32
    %25 = vector.broadcast %cst_19 : f32 to vector<6x512xf32>
    %26 = tpu.concatenate %16, %24, %25 in 0 : vector<1x512xf32>, vector<1x512xf32>, vector<6x512xf32> -> vector<8x512xf32>
    %c0_20 = arith.constant 0 : index
    %c0_21 = arith.constant 0 : index
    %27 = vector.load %arg8[%c0_20, %c0_21] : memref<8x512xf32, #tpu.memory_space<vmem>>, vector<8x512xf32>
    tpu.vector_store %arg8[%c0_20, %c0_21], %26 {strides = array<i32>} : memref<8x512xf32, #tpu.memory_space<vmem>>, vector<8x512xf32>,
    return
  }
  func.func @transform_0(%arg0: i32) -> (i32, i32) {
    %c0_i32 = arith.constant 0 : i32
    %c0_i32_0 = arith.constant 0 : i32
    return %arg0, %c0_i32 : i32, i32
  }
  func.func @transform_1(%arg0: i32) -> (i32, i32) {
    %c0_i32 = arith.constant 0 : i32
    %c0_i32_0 = arith.constant 0 : i32
    %c0_i32_1 = arith.constant 0 : i32
    return %c0_i32, %c0_i32_0 : i32, i32
  }
  func.func @transform_2(%arg0: i32) -> (i32, i32) {
    %c0_i32 = arith.constant 0 : i32
    %c0_i32_0 = arith.constant 0 : i32
    %c0_i32_1 = arith.constant 0 : i32
    return %c0_i32, %c0_i32_0 : i32, i32
  }
  func.func @transform_3(%arg0: i32) -> (i32, i32) {
    %c0_i32 = arith.constant 0 : i32
    %c0_i32_0 = arith.constant 0 : i32
    %c0_i32_1 = arith.constant 0 : i32
    return %c0_i32, %c0_i32_0 : i32, i32
  }
  func.func @transform_4(%arg0: i32) -> (i32, i32) {
    %c0_i32 = arith.constant 0 : i32
    %c0_i32_0 = arith.constant 0 : i32
    %c0_i32_1 = arith.constant 0 : i32
    return %c0_i32, %c0_i32_0 : i32, i32
  }
  func.func @transform_5(%arg0: i32) -> (i32, i32) {
    %c0_i32 = arith.constant 0 : i32
    %c0_i32_0 = arith.constant 0 : i32
    return %arg0, %c0_i32 : i32, i32
  }
  func.func @transform_6(%arg0: i32) -> (i32, i32) {
    %c0_i32 = arith.constant 0 : i32
    %c0_i32_0 = arith.constant 0 : i32
    return %arg0, %c0_i32 : i32, i32
  }
  func.func @transform_7(%arg0: i32) -> (i32, i32) {
    %c0_i32 = arith.constant 0 : i32
    %c0_i32_0 = arith.constant 0 : i32
    return %arg0, %c0_i32 : i32, i32
  }
}

</mosaic_0001>

<bundles_post_ra>
// kernel: tpu_custom_call.1
= control target key start
LH: loop header
LB: loop body
LE: loop exit
PB: predicated region body
PF: predicated region fallthrough
CT: control target
= control target key end

     0   :  { %13 = vsyncpa [#allocation3], 0  ;;  %s1754_s0 = inlined_call_operand.hbm [shape: f32[16,448], index: 0, kind: input, shape index: {}]   ;;  %s1755_s1 = inlined_call_operand.hbm [shape: f32[448,512], index: 1, kind: input, shape index: {}]   ;;  %s1756_s2 = inlined_call_operand.hbm [shape: f32[1,512], index: 2, kind: input, shape index: {}]   ;;  %s1757_s3 = inlined_call_operand.hbm [shape: f32[512,512], index: 3, kind: input, shape index: {}]   ;;  %s1758_s4 = inlined_call_operand.vmem [shape: f32[1,512], index: 4, kind: input, shape index: {}]   ;;  %s1759_s5 = inlined_call_operand.hbm [shape: f32[16,512], index: 5, kind: output, shape index: {0}]   ;;  %s1760_s6 = inlined_call_operand.hbm [shape: f32[16,512], index: 6, kind: output, shape index: {1}]   ;;  %s1761_s7 = inlined_call_operand.hbm [shape: f32[8,512], index: 7, kind: output, shape index: {2}]  }
   0x1   :  { %14 = vsyncpa [#allocation6], 0 }
   0x2   :  { %15 = vsyncpa [#allocation9], 0 }
   0x3   :  { %16 = vsyncpa [#allocation4], 0 }
   0x4   :  { %17 = vsyncpa [#allocation12], 0  ;;  %s1558_s24 = smov [#allocation5]   ;;  %s1559_s26 = smov [#allocation2]  }
   0x5   :  { %s35_s25 = sshll.u32 %s1558_s24, 4  ;;  %s23_s27 = sshll.u32 %s1559_s26, 4  ;;  %s36_s25 = int_to_ptr.vmem [resolvable:$true] %s35_s25  ;;  %s24_s27 = int_to_ptr.vmem [resolvable:$true] %s23_s27 }
   0x6   :  { %s1416_s28 = scalar_lea.vmem %s36_s25, 28672  ;;  %p1421_p1 = scmp.lt.s32.totalorder %s36_s25, %s36_s25 }
   0x7   :  { %p1417_p0 = scmp.ne.s32.totalorder %s36_s25, %s1416_s28  ;;  %p1422_p2 = scmp.lt.s32.totalorder %s1416_s28, %s1416_s28 }
   0x9   :  { %p1423_p3 = por %p1422_p2, %p1421_p1 }
   0xb   :  { %p1424_p4 = pnand %p1423_p3, %p1417_p0 }
   0xd   :  { %1427 = shalt.err (!%p1424_p4)
}
   0xe   :  { %s1560_s29 = smov 512   ;;  %s1561_s30 = smov 32  }
   0xf   :  { %41 = dma.hbm_to_vmem [thread:$0]  %s1755_s1, 28672, %s36_s25, [#allocation6], %s1560_s29, %s1560_s29, %s1561_s30  }
  0x10   :  { %s1436_s10 = scalar_lea.vmem %s24_s27, 1024  ;;  %p1441_p6 = scmp.lt.s32.totalorder %s24_s27, %s24_s27 }
  0x11   :  { %p1437_p5 = scmp.ne.s32.totalorder %s24_s27, %s1436_s10  ;;  %p1442_p7 = scmp.lt.s32.totalorder %s1436_s10, %s1436_s10 }
  0x13   :  { %p1443_p8 = por %p1442_p7, %p1441_p6 }
  0x15   :  { %p1444_p9 = pnand %p1443_p8, %p1437_p5 }
  0x17   :  { %1447 = shalt.err (!%p1444_p9)
}
  0x18   :  { %29 = dma.hbm_to_vmem [thread:$0]  %s1754_s0, 1024, %s24_s27, [#allocation3], %s1560_s29, %s1560_s29, %s1561_s30  }
  0x19   :  { %s1562_s13 = smov [#allocation7]   ;;  %s1563_s15 = smov [#allocation8]  }
  0x1a   :  { %s48_s14 = sshll.u32 %s1562_s13, 4  ;;  %s57_s16 = sshll.u32 %s1563_s15, 4  ;;  %s49_s14 = int_to_ptr.vmem [resolvable:$true] %s48_s14  ;;  %s58_s16 = int_to_ptr.vmem [resolvable:$true] %s57_s16 }
  0x1b   :  { %s1456_s1 = scalar_lea.vmem %s49_s14, 64  ;;  %p1461_p11 = scmp.lt.s32.totalorder %s49_s14, %s49_s14 }
  0x1c   :  { %p1457_p10 = scmp.ne.s32.totalorder %s49_s14, %s1456_s1  ;;  %p1462_p12 = scmp.lt.s32.totalorder %s1456_s1, %s1456_s1 }
  0x1e   :  { %p1463_p13 = por %p1462_p12, %p1461_p11 }
  0x20   :  { %p1464_p0 = pnand %p1463_p13, %p1457_p10 }
  0x22   :  { %1467 = shalt.err (!%p1464_p0)
}
  0x23   :  { %51 = dma.hbm_to_vmem [thread:$0]  %s1756_s2, 64, %s49_s14, [#allocation6]  }
  0x24   :  { %s1476_s19 = scalar_lea.vmem %s58_s16, 32768  ;;  %p1481_p2 = scmp.lt.s32.totalorder %s58_s16, %s58_s16 }
  0x25   :  { %p1477_p1 = scmp.ne.s32.totalorder %s58_s16, %s1476_s19  ;;  %p1482_p3 = scmp.lt.s32.totalorder %s1476_s19, %s1476_s19 }
  0x27   :  { %p1483_p4 = por %p1482_p3, %p1481_p2 }
  0x29   :  { %p1484_p5 = pnand %p1483_p4, %p1477_p1 }
  0x2b   :  { %1487 = shalt.err (!%p1484_p5)
}
  0x2c   :  { %63 = dma.hbm_to_vmem [thread:$0]  %s1757_s3, 32768, %s58_s16, [#allocation9], %s1560_s29, %s1560_s29, %s1561_s30  }
  0x2d   :  { %1548 = dma.done.wait [#allocation3], 1024  }
  0x2e   :  { %1549 = vsyncadd [#allocation3], 4294966272 }
  0x2f   :  { %1550 = dma.done.wait [#allocation6], 28736  }
  0x30   :  { %1551 = vsyncadd [#allocation6], 4294938560 }
  0x31   :  { %1552 = dma.done.wait [#allocation9], 32768  }
  0x32   :  { %1553 = vsyncadd [#allocation9], 4294934528  ;;  %v147_v0 = vld [vmem:[#allocation5 + $0x1e8] sm:$0xff]  ;;  %v146_v2 = vld [vmem:[#allocation5 + $0x1e0] sm:$0xff]  ;;  %vm589_vm0 = vcmask 523264   ;;  %s1564_s2 = smov [#allocation10]  }
  0x33   :  { %v275_v1 = vld [vmem:[#allocation5 + $0x5e8] sm:$0xff]  ;;  %596 = vmatprep.subr.mxu0 %v147_v0  ;;  %v274_v3 = vld [vmem:[#allocation5 + $0x5e0] sm:$0xff]  ;;  %s1352_s3 = sshll.u32 %s1564_s2, 4  ;;  %s1353_s3 = int_to_ptr.vmem [resolvable:$true] %s1352_s3 }
  0x34   :  { %673 = vmatprep.subr.mxu1 %v275_v1  ;;  %v143_v4 = vld [vmem:[#allocation5 + $0x1c8] sm:$0xff]  ;;  %597 = vmatpush1.msra.mxu0 %v146_v2  ;;  %v142_v6 = vld [vmem:[#allocation5 + $0x1c0] sm:$0xff]  ;;  %s1488_s21 = scalar_lea.vmem %s1353_s3, 1024  ;;  %p1493_p7 = scmp.lt.s32.totalorder %s1353_s3, %s1353_s3 }
  0x35   :  { %v271_v5 = vld [vmem:[#allocation5 + $0x5c8] sm:$0xff]  ;;  %674 = vmatpush1.msra.mxu1 %v274_v3  ;;  %v270_v7 = vld [vmem:[#allocation5 + $0x5c0] sm:$0xff]  ;;  %598 = vmatprep.subr.mxu0 %v143_v4  ;;  %p1489_p6 = scmp.ne.s32.totalorder %s1353_s3, %s1488_s21  ;;  %p1494_p8 = scmp.lt.s32.totalorder %s1488_s21, %s1488_s21 }
  0x36   :  { %v139_v8 = vld [vmem:[#allocation5 + $0x1a8] sm:$0xff]  ;;  %675 = vmatprep.subr.mxu1 %v271_v5  ;;  %v138_v10 = vld [vmem:[#allocation5 + $0x1a0] sm:$0xff]  ;;  %599 = vmatpush1.msra.mxu0 %v142_v6 }
  0x37   :  { %v267_v9 = vld [vmem:[#allocation5 + $0x5a8] sm:$0xff]  ;;  %v266_v11 = vld [vmem:[#allocation5 + $0x5a0] sm:$0xff]  ;;  %676 = vmatpush1.msra.mxu1 %v270_v7  ;;  %600 = vmatprep.subr.mxu0 %v139_v8  ;;  %p1495_p9 = por %p1494_p8, %p1493_p7 }
  0x38   :  { %v135_v12 = vld [vmem:[#allocation5 + $0x188] sm:$0xff]  ;;  %677 = vmatprep.subr.mxu1 %v267_v9  ;;  %v134_v14 = vld [vmem:[#allocation5 + $0x180] sm:$0xff]  ;;  %601 = vmatpush1.msra.mxu0 %v138_v10 }
  0x39   :  { %v263_v13 = vld [vmem:[#allocation5 + $0x588] sm:$0xff]  ;;  %v262_v15 = vld [vmem:[#allocation5 + $0x580] sm:$0xff]  ;;  %678 = vmatpush1.msra.mxu1 %v266_v11  ;;  %602 = vmatprep.subr.mxu0 %v135_v12  ;;  %p1496_p10 = pnand %p1495_p9, %p1489_p6 }
  0x3a   :  { %v131_v16 = vld [vmem:[#allocation5 + $0x168] sm:$0xff]  ;;  %679 = vmatprep.subr.mxu1 %v263_v13  ;;  %v130_v18 = vld [vmem:[#allocation5 + $0x160] sm:$0xff]  ;;  %603 = vmatpush1.msra.mxu0 %v134_v14 }
  0x3b   :  { %v259_v17 = vld [vmem:[#allocation5 + $0x568] sm:$0xff]  ;;  %v258_v19 = vld [vmem:[#allocation5 + $0x560] sm:$0xff]  ;;  %680 = vmatpush1.msra.mxu1 %v262_v15  ;;  %604 = vmatprep.subr.mxu0 %v131_v16 }
  0x3c   :  { %v127_v20 = vld [vmem:[#allocation5 + $0x148] sm:$0xff]  ;;  %681 = vmatprep.subr.mxu1 %v259_v17  ;;  %v126_v22 = vld [vmem:[#allocation5 + $0x140] sm:$0xff]  ;;  %605 = vmatpush1.msra.mxu0 %v130_v18 }
  0x3d   :  { %v255_v21 = vld [vmem:[#allocation5 + $0x548] sm:$0xff]  ;;  %v254_v23 = vld [vmem:[#allocation5 + $0x540] sm:$0xff]  ;;  %682 = vmatpush1.msra.mxu1 %v258_v19  ;;  %606 = vmatprep.subr.mxu0 %v127_v20 }
  0x3e   :  { %v123_v24 = vld [vmem:[#allocation5 + $0x128] sm:$0xff]  ;;  %683 = vmatprep.subr.mxu1 %v255_v21  ;;  %v122_v26 = vld [vmem:[#allocation5 + $0x120] sm:$0xff]  ;;  %607 = vmatpush1.msra.mxu0 %v126_v22 }
  0x3f   :  { %v251_v25 = vld [vmem:[#allocation5 + $0x528] sm:$0xff]  ;;  %v250_v27 = vld [vmem:[#allocation5 + $0x520] sm:$0xff]  ;;  %684 = vmatpush1.msra.mxu1 %v254_v23  ;;  %608 = vmatprep.subr.mxu0 %v123_v24 }
  0x40   :  { %v119_v28 = vld [vmem:[#allocation5 + $0x108] sm:$0xff]  ;;  %685 = vmatprep.subr.mxu1 %v251_v25  ;;  %v118_v30 = vld [vmem:[#allocation5 + $0x100] sm:$0xff]  ;;  %609 = vmatpush1.msra.mxu0 %v122_v26 }
  0x41   :  { %v247_v29 = vld [vmem:[#allocation5 + $0x508] sm:$0xff]  ;;  %v246_v31 = vld [vmem:[#allocation5 + $0x500] sm:$0xff]  ;;  %686 = vmatpush1.msra.mxu1 %v250_v27  ;;  %610 = vmatprep.subr.mxu0 %v119_v28 }
  0x42   :  { %v115_v32 = vld [vmem:[#allocation5 + $0xe8] sm:$0xff]  ;;  %687 = vmatprep.subr.mxu1 %v247_v29  ;;  %v114_v34 = vld [vmem:[#allocation5 + $0xe0] sm:$0xff]  ;;  %611 = vmatpush1.msra.mxu0 %v118_v30 }
  0x43   :  { %v243_v33 = vld [vmem:[#allocation5 + $0x4e8] sm:$0xff]  ;;  %v242_v35 = vld [vmem:[#allocation5 + $0x4e0] sm:$0xff]  ;;  %688 = vmatpush1.msra.mxu1 %v246_v31  ;;  %612 = vmatprep.subr.mxu0 %v115_v32  ;;  %v1628_v32 = vld [vmem:[#allocation2 + $0x18] sm:$0xff] }
  0x44   :  { %v111_v36 = vld [vmem:[#allocation5 + $0xc8] sm:$0xff]  ;;  %689 = vmatprep.subr.mxu1 %v243_v33  ;;  %v110_v38 = vld [vmem:[#allocation5 + $0xc0] sm:$0xff]  ;;  %613 = vmatpush1.msra.mxu0 %v114_v34  ;;  %v1630_v34 = vld [vmem:[#allocation2 + $0x10] sm:$0xff] }
  0x45   :  { %v239_v37 = vld [vmem:[#allocation5 + $0x4c8] sm:$0xff]  ;;  %v238_v39 = vld [vmem:[#allocation5 + $0x4c0] sm:$0xff]  ;;  %690 = vmatpush1.msra.mxu1 %v242_v35  ;;  %614 = vmatprep.subr.mxu0 %v111_v36  ;;  %v149_v35 = vld [vmem:[#allocation5 + $0x1f8] sm:$0xff] }
  0x46   :  { %v107_v40 = vld [vmem:[#allocation5 + $0xa8] sm:$0xff]  ;;  %691 = vmatprep.subr.mxu1 %v239_v37  ;;  %v106_v42 = vld [vmem:[#allocation5 + $0xa0] sm:$0xff]  ;;  %615 = vmatpush1.msra.mxu0 %v110_v38  ;;  %v148_v37 = vld [vmem:[#allocation5 + $0x1f0] sm:$0xff] }
  0x47   :  { %v235_v41 = vld [vmem:[#allocation5 + $0x4a8] sm:$0xff]  ;;  %v234_v43 = vld [vmem:[#allocation5 + $0x4a0] sm:$0xff]  ;;  %692 = vmatpush1.msra.mxu1 %v238_v39  ;;  %616 = vmatprep.subr.mxu0 %v107_v40  ;;  %v145_v39 = vld [vmem:[#allocation5 + $0x1d8] sm:$0xff] }
  0x48   :  { %v103_v44 = vld [vmem:[#allocation5 + $0x88] sm:$0xff]  ;;  %693 = vmatprep.subr.mxu1 %v235_v41  ;;  %v102_v46 = vld [vmem:[#allocation5 + $0x80] sm:$0xff]  ;;  %617 = vmatpush1.msra.mxu0 %v106_v42  ;;  %v144_v41 = vld [vmem:[#allocation5 + $0x1d0] sm:$0xff] }
  0x49   :  { %v231_v45 = vld [vmem:[#allocation5 + $0x488] sm:$0xff]  ;;  %v230_v47 = vld [vmem:[#allocation5 + $0x480] sm:$0xff]  ;;  %694 = vmatpush1.msra.mxu1 %v234_v43  ;;  %618 = vmatprep.subr.mxu0 %v103_v44  ;;  %v141_v43 = vld [vmem:[#allocation5 + $0x1b8] sm:$0xff] }
  0x4a   :  { %v99_v48 = vld [vmem:[#allocation5 + $0x68] sm:$0xff]  ;;  %695 = vmatprep.subr.mxu1 %v231_v45  ;;  %v98_v50 = vld [vmem:[#allocation5 + $0x60] sm:$0xff]  ;;  %619 = vmatpush1.msra.mxu0 %v102_v46  ;;  %v140_v45 = vld [vmem:[#allocation5 + $0x1b0] sm:$0xff] }
  0x4b   :  { %v227_v49 = vld [vmem:[#allocation5 + $0x468] sm:$0xff]  ;;  %v226_v51 = vld [vmem:[#allocation5 + $0x460] sm:$0xff]  ;;  %696 = vmatpush1.msra.mxu1 %v230_v47  ;;  %620 = vmatprep.subr.mxu0 %v99_v48  ;;  %v137_v47 = vld [vmem:[#allocation5 + $0x198] sm:$0xff] }
  0x4c   :  { %v95_v52 = vld [vmem:[#allocation5 + $0x48] sm:$0xff]  ;;  %697 = vmatprep.subr.mxu1 %v227_v49  ;;  %v94_v54 = vld [vmem:[#allocation5 + $0x40] sm:$0xff]  ;;  %621 = vmatpush1.msra.mxu0 %v98_v50  ;;  %v136_v49 = vld [vmem:[#allocation5 + $0x190] sm:$0xff] }
  0x4d   :  { %v223_v53 = vld [vmem:[#allocation5 + $0x448] sm:$0xff]  ;;  %v222_v55 = vld [vmem:[#allocation5 + $0x440] sm:$0xff]  ;;  %698 = vmatpush1.msra.mxu1 %v226_v51  ;;  %622 = vmatprep.subr.mxu0 %v95_v52  ;;  %v133_v51 = vld [vmem:[#allocation5 + $0x178] sm:$0xff] }
  0x4e   :  { %v91_v56 = vld [vmem:[#allocation5 + $0x28] sm:$0xff]  ;;  %699 = vmatprep.subr.mxu1 %v223_v53  ;;  %v90_v58 = vld [vmem:[#allocation5 + $0x20] sm:$0xff]  ;;  %623 = vmatpush1.msra.mxu0 %v94_v54  ;;  %v132_v53 = vld [vmem:[#allocation5 + $0x170] sm:$0xff] }
  0x4f   :  { %v219_v57 = vld [vmem:[#allocation5 + $0x428] sm:$0xff]  ;;  %v218_v59 = vld [vmem:[#allocation5 + $0x420] sm:$0xff]  ;;  %700 = vmatpush1.msra.mxu1 %v222_v55  ;;  %624 = vmatprep.subr.mxu0 %v91_v56  ;;  %v129_v55 = vld [vmem:[#allocation5 + $0x158] sm:$0xff] }
  0x50   :  { %v87_v60 = vld [vmem:[#allocation5 + $0x8] sm:$0xff]  ;;  %701 = vmatprep.subr.mxu1 %v219_v57  ;;  %v86_v62 = vld [vmem:[#allocation5] sm:$0xff]  ;;  %625 = vmatpush1.msra.mxu0 %v90_v58  ;;  %v128_v57 = vld [vmem:[#allocation5 + $0x150] sm:$0xff] }
  0x51   :  { %v215_v61 = vld [vmem:[#allocation5 + $0x408] sm:$0xff]  ;;  %v214_v63 = vld [vmem:[#allocation5 + $0x400] sm:$0xff]  ;;  %702 = vmatpush1.msra.mxu1 %v218_v59  ;;  %626 = vmatprep.subr.mxu0 %v87_v60  ;;  %v125_v59 = vld [vmem:[#allocation5 + $0x138] sm:$0xff] }
  0x52   :  { %v211_v0 = vld [vmem:[#allocation5 + $0x3e8] sm:$0xff]  ;;  %703 = vmatprep.subr.mxu1 %v215_v61  ;;  %v210_v2 = vld [vmem:[#allocation5 + $0x3e0] sm:$0xff]  ;;  %627 = vmatpush1.msra.mxu0 %v86_v62  ;;  %v124_v61 = vld [vmem:[#allocation5 + $0x130] sm:$0xff] }
  0x53   :  { %v307_v1 = vld [vmem:[#allocation5 + $0x6e8] sm:$0xff]  ;;  %v306_v3 = vld [vmem:[#allocation5 + $0x6e0] sm:$0xff]  ;;  %704 = vmatpush1.msra.mxu1 %v214_v63  ;;  %628 = vmatprep.subr.mxu0 %v211_v0  ;;  %v121_v63 = vld [vmem:[#allocation5 + $0x118] sm:$0xff] }
  0x54   :  { %v207_v4 = vld [vmem:[#allocation5 + $0x3c8] sm:$0xff]  ;;  %721 = vmatprep.subr.mxu1 %v307_v1  ;;  %v206_v6 = vld [vmem:[#allocation5 + $0x3c0] sm:$0xff]  ;;  %629 = vmatpush2.msra.mxu0 %v210_v2  ;;  %v120_v2 = vld [vmem:[#allocation5 + $0x110] sm:$0xff] }
  0x55   :  { %v303_v5 = vld [vmem:[#allocation5 + $0x6c8] sm:$0xff]  ;;  %v302_v7 = vld [vmem:[#allocation5 + $0x6c0] sm:$0xff]  ;;  %722 = vmatpush2.msra.mxu1 %v306_v3  ;;  %630 = vmatprep.subr.mxu0 %v207_v4  ;;  %v117_v4 = vld [vmem:[#allocation5 + $0xf8] sm:$0xff] }
  0x56   :  { %v203_v8 = vld [vmem:[#allocation5 + $0x3a8] sm:$0xff]  ;;  %723 = vmatprep.subr.mxu1 %v303_v5  ;;  %v202_v10 = vld [vmem:[#allocation5 + $0x3a0] sm:$0xff]  ;;  %631 = vmatpush2.msra.mxu0 %v206_v6  ;;  %v277_v5 = vld [vmem:[#allocation5 + $0x5f8] sm:$0xff] }
  0x57   :  { %v299_v9 = vld [vmem:[#allocation5 + $0x6a8] sm:$0xff]  ;;  %v298_v11 = vld [vmem:[#allocation5 + $0x6a0] sm:$0xff]  ;;  %724 = vmatpush2.msra.mxu1 %v302_v7  ;;  %632 = vmatprep.subr.mxu0 %v203_v8  ;;  %v116_v6 = vld [vmem:[#allocation5 + $0xf0] sm:$0xff] }
  0x58   :  { %v199_v12 = vld [vmem:[#allocation5 + $0x388] sm:$0xff]  ;;  %725 = vmatprep.subr.mxu1 %v299_v9  ;;  %v198_v14 = vld [vmem:[#allocation5 + $0x380] sm:$0xff]  ;;  %633 = vmatpush2.msra.mxu0 %v202_v10  ;;  %v276_v7 = vld [vmem:[#allocation5 + $0x5f0] sm:$0xff] }
  0x59   :  { %v295_v13 = vld [vmem:[#allocation5 + $0x688] sm:$0xff]  ;;  %v294_v15 = vld [vmem:[#allocation5 + $0x680] sm:$0xff]  ;;  %726 = vmatpush2.msra.mxu1 %v298_v11  ;;  %634 = vmatprep.subr.mxu0 %v199_v12  ;;  %v113_v8 = vld [vmem:[#allocation5 + $0xd8] sm:$0xff] }
  0x5a   :  { %v195_v16 = vld [vmem:[#allocation5 + $0x368] sm:$0xff]  ;;  %727 = vmatprep.subr.mxu1 %v295_v13  ;;  %v194_v18 = vld [vmem:[#allocation5 + $0x360] sm:$0xff]  ;;  %635 = vmatpush2.msra.mxu0 %v198_v14  ;;  %v273_v9 = vld [vmem:[#allocation5 + $0x5d8] sm:$0xff] }
  0x5b   :  { %v291_v17 = vld [vmem:[#allocation5 + $0x668] sm:$0xff]  ;;  %v290_v19 = vld [vmem:[#allocation5 + $0x660] sm:$0xff]  ;;  %728 = vmatpush2.msra.mxu1 %v294_v15  ;;  %636 = vmatprep.subr.mxu0 %v195_v16  ;;  %v112_v11 = vld [vmem:[#allocation5 + $0xd0] sm:$0xff] }
  0x5c   :  { %v191_v20 = vld [vmem:[#allocation5 + $0x348] sm:$0xff]  ;;  %729 = vmatprep.subr.mxu1 %v291_v17  ;;  %v190_v22 = vld [vmem:[#allocation5 + $0x340] sm:$0xff]  ;;  %637 = vmatpush2.msra.mxu0 %v194_v18  ;;  %v272_v12 = vld [vmem:[#allocation5 + $0x5d0] sm:$0xff] }
  0x5d   :  { %v287_v21 = vld [vmem:[#allocation5 + $0x648] sm:$0xff]  ;;  %v286_v23 = vld [vmem:[#allocation5 + $0x640] sm:$0xff]  ;;  %730 = vmatpush2.msra.mxu1 %v290_v19  ;;  %638 = vmatprep.subr.mxu0 %v191_v20  ;;  %v109_v13 = vld [vmem:[#allocation5 + $0xb8] sm:$0xff] }
  0x5e   :  { %v187_v24 = vld [vmem:[#allocation5 + $0x328] sm:$0xff]  ;;  %731 = vmatprep.subr.mxu1 %v287_v21  ;;  %v186_v26 = vld [vmem:[#allocation5 + $0x320] sm:$0xff]  ;;  %639 = vmatpush2.msra.mxu0 %v190_v22  ;;  %v269_v15 = vld [vmem:[#allocation5 + $0x5b8] sm:$0xff] }
  0x5f   :  { %v283_v25 = vld [vmem:[#allocation5 + $0x628] sm:$0xff]  ;;  %v282_v27 = vld [vmem:[#allocation5 + $0x620] sm:$0xff]  ;;  %732 = vmatpush2.msra.mxu1 %v286_v23  ;;  %640 = vmatprep.subr.mxu0 %v187_v24  ;;  %v1646_v16 = vld [vmem:[#allocation2 + $0x38] sm:$0xff] }
  0x60   :  { %v183_v28 = vld [vmem:[#allocation5 + $0x308] sm:$0xff]  ;;  %733 = vmatprep.subr.mxu1 %v283_v25  ;;  %v182_v30 = vld [vmem:[#allocation5 + $0x300] sm:$0xff]  ;;  %641 = vmatpush2.msra.mxu0 %v186_v26  ;;  %v108_v17 = vld [vmem:[#allocation5 + $0xb0] sm:$0xff] }
  0x61   :  { %v279_v29 = vld [vmem:[#allocation5 + $0x608] sm:$0xff]  ;;  %v278_v31 = vld [vmem:[#allocation5 + $0x600] sm:$0xff]  ;;  %734 = vmatpush2.msra.mxu1 %v282_v27  ;;  %642 = vmatprep.subr.mxu0 %v183_v28  ;;  %v268_v18 = vld [vmem:[#allocation5 + $0x5b0] sm:$0xff] }
  0x62   :  { %v179_v33 = vld [vmem:[#allocation5 + $0x2e8] sm:$0xff]  ;;  %735 = vmatprep.subr.mxu1 %v279_v29  ;;  %643 = vmatpush2.msra.mxu0 %v182_v30  ;;  %v178_v36 = vld [vmem:[#allocation5 + $0x2e0] sm:$0xff]  ;;  %v1648_v19 = vld [vmem:[#allocation2 + $0x30] sm:$0xff] }
  0x63   :  { %736 = vmatpush2.msra.mxu1 %v278_v31  ;;  %1395 = vmatprep.mubr.msk.f32.mxu1 %vm589_vm0, %v1628_v32  ;;  %v175_v38 = vld [vmem:[#allocation5 + $0x2c8] sm:$0xff]  ;;  %v174_v40 = vld [vmem:[#allocation5 + $0x2c0] sm:$0xff]  ;;  %v105_v20 = vld [vmem:[#allocation5 + $0x98] sm:$0xff] }
  0x64   :  { %644 = vmatprep.subr.mxu0 %v179_v33  ;;  %738 = vmatmul.mubr.f32.vlgmr.msra.gmra.mxu1 %v1630_v34  ;;  %v171_v42 = vld [vmem:[#allocation5 + $0x2a8] sm:$0xff]  ;;  %v170_v44 = vld [vmem:[#allocation5 + $0x2a0] sm:$0xff]  ;;  %v265_v21 = vld [vmem:[#allocation5 + $0x598] sm:$0xff] }
  0x65   :  { %750 = vmatprep.subr.mxu1 %v149_v35  ;;  %645 = vmatpush2.msra.mxu0 %v178_v36  ;;  %v167_v46 = vld [vmem:[#allocation5 + $0x288] sm:$0xff]  ;;  %v166_v48 = vld [vmem:[#allocation5 + $0x280] sm:$0xff]  ;;  %v104_v22 = vld [vmem:[#allocation5 + $0x90] sm:$0xff] }
  0x66   :  { %751 = vmatpush1.msra.mxu1 %v148_v37  ;;  %646 = vmatprep.subr.mxu0 %v175_v38  ;;  %v163_v50 = vld [vmem:[#allocation5 + $0x268] sm:$0xff]  ;;  %v162_v52 = vld [vmem:[#allocation5 + $0x260] sm:$0xff]  ;;  %v264_v23 = vld [vmem:[#allocation5 + $0x590] sm:$0xff] }
  0x67   :  { %752 = vmatprep.subr.mxu1 %v145_v39  ;;  %647 = vmatpush2.msra.mxu0 %v174_v40  ;;  %v159_v54 = vld [vmem:[#allocation5 + $0x248] sm:$0xff]  ;;  %v158_v56 = vld [vmem:[#allocation5 + $0x240] sm:$0xff]  ;;  %v101_v24 = vld [vmem:[#allocation5 + $0x78] sm:$0xff] }
  0x68   :  { %753 = vmatpush1.msra.mxu1 %v144_v41  ;;  %648 = vmatprep.subr.mxu0 %v171_v42  ;;  %v155_v58 = vld [vmem:[#allocation5 + $0x228] sm:$0xff]  ;;  %v154_v60 = vld [vmem:[#allocation5 + $0x220] sm:$0xff]  ;;  %v261_v25 = vld [vmem:[#allocation5 + $0x578] sm:$0xff] }
  0x69   :  { %754 = vmatprep.subr.mxu1 %v141_v43  ;;  %649 = vmatpush2.msra.mxu0 %v170_v44  ;;  %v151_v62 = vld [vmem:[#allocation5 + $0x208] sm:$0xff]  ;;  %v150_v0 = vld [vmem:[#allocation5 + $0x200] sm:$0xff]  ;;  %v100_v26 = vld [vmem:[#allocation5 + $0x70] sm:$0xff] }
  0x6a   :  { %755 = vmatpush1.msra.mxu1 %v140_v45  ;;  %650 = vmatprep.subr.mxu0 %v167_v46  ;;  %v1635_v1 = vld [vmem:[#allocation2 + $0x8] sm:$0xff]  ;;  %v1637_v3 = vld [vmem:[#allocation2] sm:$0xff]  ;;  %v260_v27 = vld [vmem:[#allocation5 + $0x570] sm:$0xff] }
  0x6b   :  { %756 = vmatprep.subr.mxu1 %v137_v47  ;;  %651 = vmatpush2.msra.mxu0 %v166_v48  ;;  %v1641_v10 = vld [vmem:[#allocation2 + $0x28] sm:$0xff]  ;;  %v1643_v14 = vld [vmem:[#allocation2 + $0x20] sm:$0xff]  ;;  %v97_v28 = vld [vmem:[#allocation5 + $0x58] sm:$0xff] }
  0x6c   :  { %757 = vmatpush1.msra.mxu1 %v136_v49  ;;  %652 = vmatprep.subr.mxu0 %v163_v50  ;;  %v257_v29 = vld [vmem:[#allocation5 + $0x558] sm:$0xff]  ;;  %v96_v30 = vld [vmem:[#allocation5 + $0x50] sm:$0xff] }
  0x6d   :  { %758 = vmatprep.subr.mxu1 %v133_v51  ;;  %653 = vmatpush2.msra.mxu0 %v162_v52  ;;  %v256_v31 = vld [vmem:[#allocation5 + $0x550] sm:$0xff]  ;;  %v93_v33 = vld [vmem:[#allocation5 + $0x38] sm:$0xff] }
  0x6e   :  { %759 = vmatpush1.msra.mxu1 %v132_v53  ;;  %654 = vmatprep.subr.mxu0 %v159_v54  ;;  %v253_v35 = vld [vmem:[#allocation5 + $0x538] sm:$0xff]  ;;  %v92_v36 = vld [vmem:[#allocation5 + $0x30] sm:$0xff] }
  0x6f   :  { %760 = vmatprep.subr.mxu1 %v129_v55  ;;  %655 = vmatpush2.msra.mxu0 %v158_v56  ;;  %v252_v37 = vld [vmem:[#allocation5 + $0x530] sm:$0xff]  ;;  %v89_v38 = vld [vmem:[#allocation5 + $0x18] sm:$0xff] }
  0x70   :  { %761 = vmatpush1.msra.mxu1 %v128_v57  ;;  %656 = vmatprep.subr.mxu0 %v155_v58  ;;  %v249_v39 = vld [vmem:[#allocation5 + $0x518] sm:$0xff]  ;;  %v88_v40 = vld [vmem:[#allocation5 + $0x10] sm:$0xff] }
  0x71   :  { %762 = vmatprep.subr.mxu1 %v125_v59  ;;  %657 = vmatpush2.msra.mxu0 %v154_v60  ;;  %v248_v41 = vld [vmem:[#allocation5 + $0x510] sm:$0xff]  ;;  %v213_v42 = vld [vmem:[#allocation5 + $0x3f8] sm:$0xff] }
  0x72   :  { %763 = vmatpush1.msra.mxu1 %v124_v61  ;;  %658 = vmatprep.subr.mxu0 %v151_v62  ;;  %v245_v43 = vld [vmem:[#allocation5 + $0x4f8] sm:$0xff]  ;;  %v212_v44 = vld [vmem:[#allocation5 + $0x3f0] sm:$0xff] }
  0x73   :  { %764 = vmatprep.subr.mxu1 %v121_v63  ;;  %659 = vmatpush2.msra.mxu0 %v150_v0  ;;  %v244_v45 = vld [vmem:[#allocation5 + $0x4f0] sm:$0xff]  ;;  %v209_v46 = vld [vmem:[#allocation5 + $0x3d8] sm:$0xff] }
  0x74   :  { %660 = vmatprep.mubr.f32.mxu0 %v1635_v1  ;;  %765 = vmatpush1.msra.mxu1 %v120_v2  ;;  %v241_v47 = vld [vmem:[#allocation5 + $0x4d8] sm:$0xff]  ;;  %v208_v48 = vld [vmem:[#allocation5 + $0x3d0] sm:$0xff] }
  0x75   :  { %661 = vmatmul.mubr.f32.vlgmr.msra.gmra.mxu0 %v1637_v3  ;;  %766 = vmatprep.subr.mxu1 %v117_v4  ;;  %v240_v49 = vld [vmem:[#allocation5 + $0x4d0] sm:$0xff]  ;;  %v205_v50 = vld [vmem:[#allocation5 + $0x3b8] sm:$0xff] }
  0x76   :  { %827 = vmatprep.subr.mxu0 %v277_v5  ;;  %767 = vmatpush1.msra.mxu1 %v116_v6  ;;  %v237_v51 = vld [vmem:[#allocation5 + $0x4b8] sm:$0xff]  ;;  %v204_v52 = vld [vmem:[#allocation5 + $0x3b0] sm:$0xff] }
  0x77   :  { %828 = vmatpush1.msra.mxu0 %v276_v7  ;;  %768 = vmatprep.subr.mxu1 %v113_v8  ;;  %v236_v53 = vld [vmem:[#allocation5 + $0x4b0] sm:$0xff]  ;;  %v201_v54 = vld [vmem:[#allocation5 + $0x398] sm:$0xff] }
  0x78   :  { %829 = vmatprep.subr.mxu0 %v273_v9  ;;  %666 = vmatprep.mubr.f32.mxu0 %v1641_v10  ;;  %v233_v55 = vld [vmem:[#allocation5 + $0x498] sm:$0xff]  ;;  %v200_v56 = vld [vmem:[#allocation5 + $0x390] sm:$0xff] }
  0x79   :  { %769 = vmatpush1.msra.mxu1 %v112_v11  ;;  %830 = vmatpush1.msra.mxu0 %v272_v12  ;;  %v232_v57 = vld [vmem:[#allocation5 + $0x490] sm:$0xff]  ;;  %v197_v58 = vld [vmem:[#allocation5 + $0x378] sm:$0xff] }
  0x7a   :  { %770 = vmatprep.subr.mxu1 %v109_v13  ;;  %667 = vmatmul.mubr.f32.gmra.mxu0 %v1643_v14  ;;  %v229_v59 = vld [vmem:[#allocation5 + $0x478] sm:$0xff]  ;;  %v196_v60 = vld [vmem:[#allocation5 + $0x370] sm:$0xff] }
  0x7b   :  { %831 = vmatprep.subr.mxu0 %v269_v15  ;;  %1396 = vmatprep.mubr.msk.f32.mxu1 %vm589_vm0, %v1646_v16  ;;  %v228_v61 = vld [vmem:[#allocation5 + $0x470] sm:$0xff]  ;;  %v193_v62 = vld [vmem:[#allocation5 + $0x358] sm:$0xff] }
  0x7c   :  { %771 = vmatpush1.msra.mxu1 %v108_v17  ;;  %832 = vmatpush1.msra.mxu0 %v268_v18  ;;  %v225_v63 = vld [vmem:[#allocation5 + $0x458] sm:$0xff]  ;;  %v192_v0 = vld [vmem:[#allocation5 + $0x350] sm:$0xff] }
  0x7d   :  { %744 = vmatmul.mubr.f32.gmra.mxu1 %v1648_v19  ;;  %772 = vmatprep.subr.mxu1 %v105_v20  ;;  %v224_v2 = vld [vmem:[#allocation5 + $0x450] sm:$0xff]  ;;  %v189_v4 = vld [vmem:[#allocation5 + $0x338] sm:$0xff] }
  0x7e   :  { %833 = vmatprep.subr.mxu0 %v265_v21  ;;  %773 = vmatpush1.msra.mxu1 %v104_v22  ;;  %v221_v5 = vld [vmem:[#allocation5 + $0x438] sm:$0xff]  ;;  %v188_v6 = vld [vmem:[#allocation5 + $0x330] sm:$0xff] }
  0x7f   :  { %834 = vmatpush1.msra.mxu0 %v264_v23  ;;  %774 = vmatprep.subr.mxu1 %v101_v24  ;;  %v220_v7 = vld [vmem:[#allocation5 + $0x430] sm:$0xff]  ;;  %v185_v8 = vld [vmem:[#allocation5 + $0x318] sm:$0xff] }
  0x80   :  { %835 = vmatprep.subr.mxu0 %v261_v25  ;;  %775 = vmatpush1.msra.mxu1 %v100_v26  ;;  %v217_v9 = vld [vmem:[#allocation5 + $0x418] sm:$0xff]  ;;  %v184_v11 = vld [vmem:[#allocation5 + $0x310] sm:$0xff] }
  0x81   :  { %836 = vmatpush1.msra.mxu0 %v260_v27  ;;  %776 = vmatprep.subr.mxu1 %v97_v28  ;;  %v216_v12 = vld [vmem:[#allocation5 + $0x410] sm:$0xff]  ;;  %v181_v13 = vld [vmem:[#allocation5 + $0x2f8] sm:$0xff] }
  0x82   :  { %837 = vmatprep.subr.mxu0 %v257_v29  ;;  %777 = vmatpush1.msra.mxu1 %v96_v30  ;;  %v309_v15 = vld [vmem:[#allocation5 + $0x6f8] sm:$0xff]  ;;  %v180_v17 = vld [vmem:[#allocation5 + $0x2f0] sm:$0xff] }
  0x83   :  { %838 = vmatpush1.msra.mxu0 %v256_v31  ;;  %778 = vmatprep.subr.mxu1 %v93_v33  ;;  %v308_v18 = vld [vmem:[#allocation5 + $0x6f0] sm:$0xff]  ;;  %v177_v20 = vld [vmem:[#allocation5 + $0x2d8] sm:$0xff] }
  0x84   :  { %839 = vmatprep.subr.mxu0 %v253_v35  ;;  %779 = vmatpush1.msra.mxu1 %v92_v36  ;;  %v305_v21 = vld [vmem:[#allocation5 + $0x6d8] sm:$0xff]  ;;  %v176_v22 = vld [vmem:[#allocation5 + $0x2d0] sm:$0xff] }
  0x85   :  { %840 = vmatpush1.msra.mxu0 %v252_v37  ;;  %780 = vmatprep.subr.mxu1 %v89_v38  ;;  %v304_v23 = vld [vmem:[#allocation5 + $0x6d0] sm:$0xff]  ;;  %v173_v24 = vld [vmem:[#allocation5 + $0x2b8] sm:$0xff] }
  0x86   :  { %841 = vmatprep.subr.mxu0 %v249_v39  ;;  %781 = vmatpush1.msra.mxu1 %v88_v40  ;;  %v301_v25 = vld [vmem:[#allocation5 + $0x6b8] sm:$0xff]  ;;  %v172_v26 = vld [vmem:[#allocation5 + $0x2b0] sm:$0xff] }
  0x87   :  { %842 = vmatpush1.msra.mxu0 %v248_v41  ;;  %782 = vmatprep.subr.mxu1 %v213_v42  ;;  %v300_v27 = vld [vmem:[#allocation5 + $0x6b0] sm:$0xff]  ;;  %v169_v28 = vld [vmem:[#allocation5 + $0x298] sm:$0xff] }
  0x88   :  { %843 = vmatprep.subr.mxu0 %v245_v43  ;;  %783 = vmatpush2.msra.mxu1 %v212_v44  ;;  %v297_v29 = vld [vmem:[#allocation5 + $0x698] sm:$0xff]  ;;  %v168_v30 = vld [vmem:[#allocation5 + $0x290] sm:$0xff] }
  0x89   :  { %844 = vmatpush1.msra.mxu0 %v244_v45  ;;  %784 = vmatprep.subr.mxu1 %v209_v46  ;;  %v296_v31 = vld [vmem:[#allocation5 + $0x690] sm:$0xff]  ;;  %v165_v33 = vld [vmem:[#allocation5 + $0x278] sm:$0xff] }
  0x8a   :  { %845 = vmatprep.subr.mxu0 %v241_v47  ;;  %785 = vmatpush2.msra.mxu1 %v208_v48  ;;  %v293_v35 = vld [vmem:[#allocation5 + $0x678] sm:$0xff]  ;;  %v164_v36 = vld [vmem:[#allocation5 + $0x270] sm:$0xff] }
  0x8b   :  { %846 = vmatpush1.msra.mxu0 %v240_v49  ;;  %786 = vmatprep.subr.mxu1 %v205_v50  ;;  %v292_v37 = vld [vmem:[#allocation5 + $0x670] sm:$0xff]  ;;  %v161_v38 = vld [vmem:[#allocation5 + $0x258] sm:$0xff] }
  0x8c   :  { %847 = vmatprep.subr.mxu0 %v237_v51  ;;  %787 = vmatpush2.msra.mxu1 %v204_v52  ;;  %v289_v39 = vld [vmem:[#allocation5 + $0x658] sm:$0xff]  ;;  %v160_v40 = vld [vmem:[#allocation5 + $0x250] sm:$0xff]  ;;  %v371_v51 = vld [vmem:[#allocation8 + $0x1e0] sm:$0xff] }
  0x8d   :  { %848 = vmatpush1.msra.mxu0 %v236_v53  ;;  %788 = vmatprep.subr.mxu1 %v201_v54  ;;  %v288_v41 = vld [vmem:[#allocation5 + $0x650] sm:$0xff]  ;;  %v157_v42 = vld [vmem:[#allocation5 + $0x238] sm:$0xff]  ;;  %v499_v53 = vld [vmem:[#allocation8 + $0x5e0] sm:$0xff] }
  0x8e   :  { %849 = vmatprep.subr.mxu0 %v233_v55  ;;  %789 = vmatpush2.msra.mxu1 %v200_v56  ;;  %v285_v43 = vld [vmem:[#allocation5 + $0x638] sm:$0xff]  ;;  %v156_v44 = vld [vmem:[#allocation5 + $0x230] sm:$0xff]  ;;  %v367_v55 = vld [vmem:[#allocation8 + $0x1c0] sm:$0xff] }
  0x8f   :  { %850 = vmatpush1.msra.mxu0 %v232_v57  ;;  %790 = vmatprep.subr.mxu1 %v197_v58  ;;  %v284_v45 = vld [vmem:[#allocation5 + $0x630] sm:$0xff]  ;;  %v153_v46 = vld [vmem:[#allocation5 + $0x218] sm:$0xff]  ;;  %v491_v56 = vld [vmem:[#allocation8 + $0x5a0] sm:$0xff] }
  0x90   :  { %851 = vmatprep.subr.mxu0 %v229_v59  ;;  %791 = vmatpush2.msra.mxu1 %v196_v60  ;;  %v281_v47 = vld [vmem:[#allocation5 + $0x618] sm:$0xff]  ;;  %v152_v48 = vld [vmem:[#allocation5 + $0x210] sm:$0xff]  ;;  %v359_v58 = vld [vmem:[#allocation8 + $0x180] sm:$0xff] }
  0x91   :  { %852 = vmatpush1.msra.mxu0 %v228_v61  ;;  %792 = vmatprep.subr.mxu1 %v193_v62  ;;  %v280_v49 = vld [vmem:[#allocation5 + $0x610] sm:$0xff]  ;;  %v351_v60 = vld [vmem:[#allocation8 + $0x140] sm:$0xff] }
  0x92   :  { %853 = vmatprep.subr.mxu0 %v225_v63  ;;  %793 = vmatpush2.msra.mxu1 %v192_v0  ;;  %v372_v50 = vld [vmem:[#allocation8 + $0x1e8] sm:$0xff]  ;;  %v347_v62 = vld [vmem:[#allocation8 + $0x120] sm:$0xff] }
  0x93   :  { %854 = vmatpush1.msra.mxu0 %v224_v2  ;;  %794 = vmatprep.subr.mxu1 %v189_v4  ;;  %v500_v52 = vld [vmem:[#allocation8 + $0x5e8] sm:$0xff]  ;;  %v343_v0 = vld [vmem:[#allocation8 + $0x100] sm:$0xff] }
  0x94   :  { %855 = vmatprep.subr.mxu0 %v221_v5  ;;  %795 = vmatpush2.msra.mxu1 %v188_v6  ;;  %v368_v54 = vld [vmem:[#allocation8 + $0x1c8] sm:$0xff]  ;;  %v487_v2 = vld [vmem:[#allocation8 + $0x580] sm:$0xff] }
  0x95   :  { %856 = vmatpush1.msra.mxu0 %v220_v7  ;;  %796 = vmatprep.subr.mxu1 %v185_v8  ;;  %v488_v57 = vld [vmem:[#allocation8 + $0x588] sm:$0xff]  ;;  %v339_v6 = vld [vmem:[#allocation8 + $0xe0] sm:$0xff] }
  0x96   :  { %857 = vmatprep.subr.mxu0 %v217_v9  ;;  %797 = vmatpush2.msra.mxu1 %v184_v11  ;;  %v356_v59 = vld [vmem:[#allocation8 + $0x168] sm:$0xff]  ;;  %v483_v7 = vld [vmem:[#allocation8 + $0x560] sm:$0xff] }
  0x97   :  { %858 = vmatpush1.msra.mxu0 %v216_v12  ;;  %798 = vmatprep.subr.mxu1 %v181_v13  ;;  %v348_v61 = vld [vmem:[#allocation8 + $0x128] sm:$0xff]  ;;  %v335_v11 = vld [vmem:[#allocation8 + $0xc0] sm:$0xff] }
  0x98   :  { %875 = vmatprep.subr.mxu0 %v309_v15  ;;  %799 = vmatpush2.msra.mxu1 %v180_v17  ;;  %v344_v63 = vld [vmem:[#allocation8 + $0x108] sm:$0xff]  ;;  %v479_v12 = vld [vmem:[#allocation8 + $0x540] sm:$0xff] }
  0x99   :  { %876 = vmatpush2.msra.mxu0 %v308_v18  ;;  %800 = vmatprep.subr.mxu1 %v177_v20  ;;  %v340_v4 = vld [vmem:[#allocation8 + $0xe8] sm:$0xff]  ;;  %v331_v17 = vld [vmem:[#allocation8 + $0xa0] sm:$0xff] }
  0x9a   :  { %877 = vmatprep.subr.mxu0 %v305_v21  ;;  %801 = vmatpush2.msra.mxu1 %v176_v22  ;;  %v484_v5 = vld [vmem:[#allocation8 + $0x568] sm:$0xff]  ;;  %v475_v18 = vld [vmem:[#allocation8 + $0x520] sm:$0xff] }
  0x9b   :  { %878 = vmatpush2.msra.mxu0 %v304_v23  ;;  %802 = vmatprep.subr.mxu1 %v173_v24  ;;  %v336_v8 = vld [vmem:[#allocation8 + $0xc8] sm:$0xff]  ;;  %v327_v22 = vld [vmem:[#allocation8 + $0x80] sm:$0xff] }
  0x9c   :  { %879 = vmatprep.subr.mxu0 %v301_v25  ;;  %803 = vmatpush2.msra.mxu1 %v172_v26  ;;  %v480_v9 = vld [vmem:[#allocation8 + $0x548] sm:$0xff]  ;;  %v471_v23 = vld [vmem:[#allocation8 + $0x500] sm:$0xff] }
  0x9d   :  { %880 = vmatpush2.msra.mxu0 %v300_v27  ;;  %804 = vmatprep.subr.mxu1 %v169_v28  ;;  %v332_v13 = vld [vmem:[#allocation8 + $0xa8] sm:$0xff]  ;;  %v323_v26 = vld [vmem:[#allocation8 + $0x60] sm:$0xff] }
  0x9e   :  { %881 = vmatprep.subr.mxu0 %v297_v29  ;;  %805 = vmatpush2.msra.mxu1 %v168_v30  ;;  %v476_v15 = vld [vmem:[#allocation8 + $0x528] sm:$0xff]  ;;  %v467_v27 = vld [vmem:[#allocation8 + $0x4e0] sm:$0xff] }
  0x9f   :  { %882 = vmatpush2.msra.mxu0 %v296_v31  ;;  %806 = vmatprep.subr.mxu1 %v165_v33  ;;  %v328_v20 = vld [vmem:[#allocation8 + $0x88] sm:$0xff]  ;;  %v319_v30 = vld [vmem:[#allocation8 + $0x40] sm:$0xff] }
  0xa0   :  { %883 = vmatprep.subr.mxu0 %v293_v35  ;;  %807 = vmatpush2.msra.mxu1 %v164_v36  ;;  %v472_v21 = vld [vmem:[#allocation8 + $0x508] sm:$0xff]  ;;  %v463_v31 = vld [vmem:[#allocation8 + $0x4c0] sm:$0xff] }
  0xa1   :  { %884 = vmatpush2.msra.mxu0 %v292_v37  ;;  %808 = vmatprep.subr.mxu1 %v161_v38  ;;  %v324_v24 = vld [vmem:[#allocation8 + $0x68] sm:$0xff]  ;;  %v459_v36 = vld [vmem:[#allocation8 + $0x4a0] sm:$0xff] }
  0xa2   :  { %885 = vmatprep.subr.mxu0 %v289_v39  ;;  %809 = vmatpush2.msra.mxu1 %v160_v40  ;;  %v468_v25 = vld [vmem:[#allocation8 + $0x4e8] sm:$0xff]  ;;  %v315_v37 = vld [vmem:[#allocation8 + $0x20] sm:$0xff] }
  0xa3   :  { %886 = vmatpush2.msra.mxu0 %v288_v41  ;;  %810 = vmatprep.subr.mxu1 %v157_v42  ;;  %v320_v28 = vld [vmem:[#allocation8 + $0x48] sm:$0xff]  ;;  %v455_v39 = vld [vmem:[#allocation8 + $0x480] sm:$0xff] }
  0xa4   :  { %887 = vmatprep.subr.mxu0 %v285_v43  ;;  %811 = vmatpush2.msra.mxu1 %v156_v44  ;;  %v464_v29 = vld [vmem:[#allocation8 + $0x4c8] sm:$0xff]  ;;  %v311_v42 = vld [vmem:[#allocation8] sm:$0xff] }
  0xa5   :  { %888 = vmatpush2.msra.mxu0 %v284_v45  ;;  %812 = vmatprep.subr.mxu1 %v153_v46  ;;  %v460_v33 = vld [vmem:[#allocation8 + $0x4a8] sm:$0xff]  ;;  %v451_v43 = vld [vmem:[#allocation8 + $0x460] sm:$0xff] }
  0xa6   :  { %889 = vmatprep.subr.mxu0 %v281_v47  ;;  %813 = vmatpush2.msra.mxu1 %v152_v48  ;;  %v316_v35 = vld [vmem:[#allocation8 + $0x28] sm:$0xff]  ;;  %v435_v46 = vld [vmem:[#allocation8 + $0x3e0] sm:$0xff] }
  0xa7   :  { %814 = vmatprep.mubr.f32.mxu1 %v1635_v1  ;;  %890 = vmatpush2.msra.mxu0 %v280_v49  ;;  %v496_v1 = vld [vmem:[#allocation8 + $0x5c8] sm:$0xff]  ;;  %v447_v47 = vld [vmem:[#allocation8 + $0x440] sm:$0xff] }
  0xa8   :  { %1397 = vmatprep.mubr.msk.f32.mxu0 %vm589_vm0, %v1628_v32  ;;  %815 = vmatmul.mubr.f32.vlgmr.msra.gmra.mxu1 %v1637_v3  ;;  %v495_v32 = vld [vmem:[#allocation8 + $0x5c0] sm:$0xff]  ;;  %v492_v3 = vld [vmem:[#allocation8 + $0x5a8] sm:$0xff] }
  0xa9   :  { %892 = vmatmul.mubr.f32.vlgmr.msra.gmra.mxu0 %v1630_v34  ;;  %820 = vmatprep.mubr.f32.mxu1 %v1641_v10  ;;  %v364_v34 = vld [vmem:[#allocation8 + $0x1a8] sm:$0xff]  ;;  %v363_v10 = vld [vmem:[#allocation8 + $0x1a0] sm:$0xff] }
  0xaa   :  { %1398 = vmatprep.mubr.msk.f32.mxu0 %vm589_vm0, %v1646_v16  ;;  %933 = vmatprep.subr.mxu0 %v372_v50  ;;  %v360_v16 = vld [vmem:[#allocation8 + $0x188] sm:$0xff]  ;;  %v431_v50 = vld [vmem:[#allocation8 + $0x3c0] sm:$0xff] }
  0xab   :  { %1010 = vmatprep.subr.mxu1 %v500_v52  ;;  %934 = vmatpush1.msra.mxu0 %v371_v51  ;;  %v456_v38 = vld [vmem:[#allocation8 + $0x488] sm:$0xff]  ;;  %v443_v51 = vld [vmem:[#allocation8 + $0x420] sm:$0xff] }
  0xac   :  { %1011 = vmatpush1.msra.mxu1 %v499_v53  ;;  %935 = vmatprep.subr.mxu0 %v368_v54  ;;  %v312_v40 = vld [vmem:[#allocation8 + $0x8] sm:$0xff]  ;;  %v427_v54 = vld [vmem:[#allocation8 + $0x3a0] sm:$0xff] }
  0xad   :  { %821 = vmatmul.mubr.f32.gmra.mxu1 %v1643_v14  ;;  %898 = vmatmul.mubr.f32.gmra.mxu0 %v1648_v19  ;;  %v355_v14 = vld [vmem:[#allocation8 + $0x160] sm:$0xff]  ;;  %v352_v19 = vld [vmem:[#allocation8 + $0x148] sm:$0xff] }
  0xae   :  { %1012 = vmatprep.subr.mxu1 %v496_v1  ;;  %936 = vmatpush1.msra.mxu0 %v367_v55  ;;  %v452_v41 = vld [vmem:[#allocation8 + $0x468] sm:$0xff]  ;;  %v439_v1 = vld [vmem:[#allocation8 + $0x400] sm:$0xff] }
  0xaf   :  { %1013 = vmatpush1.msra.mxu1 %v495_v32  ;;  %937 = vmatprep.subr.mxu0 %v364_v34  ;;  %v436_v44 = vld [vmem:[#allocation8 + $0x3e8] sm:$0xff]  ;;  %v423_v34 = vld [vmem:[#allocation8 + $0x380] sm:$0xff] }
  0xb0   :  { %1014 = vmatprep.subr.mxu1 %v492_v3  ;;  %938 = vmatpush1.msra.mxu0 %v363_v10  ;;  %v448_v45 = vld [vmem:[#allocation8 + $0x448] sm:$0xff]  ;;  %v563_v3 = vld [vmem:[#allocation8 + $0x7e0] sm:$0xff] }
  0xb1   :  { %1015 = vmatpush1.msra.mxu1 %v491_v56  ;;  %939 = vmatprep.subr.mxu0 %v360_v16  ;;  %v432_v48 = vld [vmem:[#allocation8 + $0x3c8] sm:$0xff]  ;;  %v419_v16 = vld [vmem:[#allocation8 + $0x360] sm:$0xff] }
  0xb2   :  { %1016 = vmatprep.subr.mxu1 %v488_v57  ;;  %940 = vmatpush1.msra.mxu0 %v359_v58  ;;  %v444_v49 = vld [vmem:[#allocation8 + $0x428] sm:$0xff]  ;;  %v559_v57 = vld [vmem:[#allocation8 + $0x7c0] sm:$0xff] }
  0xb3   :  { %941 = vmatprep.subr.mxu0 %v356_v59  ;;  %1017 = vmatpush1.msra.mxu1 %v487_v2  ;;  %v428_v52 = vld [vmem:[#allocation8 + $0x3a8] sm:$0xff] }
  0xb4   :  { %942 = vmatpush1.msra.mxu0 %v355_v14  ;;  %1018 = vmatprep.subr.mxu1 %v484_v5  ;;  %v440_v53 = vld [vmem:[#allocation8 + $0x408] sm:$0xff]  ;;  %v415_v14 = vld [vmem:[#allocation8 + $0x340] sm:$0xff] }
  0xb5   :  { %943 = vmatprep.subr.mxu0 %v352_v19  ;;  %1019 = vmatpush1.msra.mxu1 %v483_v7  ;;  %v424_v55 = vld [vmem:[#allocation8 + $0x388] sm:$0xff]  ;;  %v555_v19 = vld [vmem:[#allocation8 + $0x7a0] sm:$0xff] }
  0xb6   :  { %944 = vmatpush1.msra.mxu0 %v351_v60  ;;  %1020 = vmatprep.subr.mxu1 %v480_v9  ;;  %v564_v32 = vld [vmem:[#allocation8 + $0x7e8] sm:$0xff]  ;;  %v547_v5 = vld [vmem:[#allocation8 + $0x760] sm:$0xff] }
  0xb7   :  { %945 = vmatprep.subr.mxu0 %v348_v61  ;;  %1021 = vmatpush1.msra.mxu1 %v479_v12  ;;  %v420_v10 = vld [vmem:[#allocation8 + $0x368] sm:$0xff]  ;;  %v543_v9 = vld [vmem:[#allocation8 + $0x740] sm:$0xff] }
  0xb8   :  { %946 = vmatpush1.msra.mxu0 %v347_v62  ;;  %1022 = vmatprep.subr.mxu1 %v476_v15  ;;  %v560_v56 = vld [vmem:[#allocation8 + $0x7c8] sm:$0xff]  ;;  %v411_v62 = vld [vmem:[#allocation8 + $0x320] sm:$0xff] }
  0xb9   :  { %947 = vmatprep.subr.mxu0 %v344_v63  ;;  %1023 = vmatpush1.msra.mxu1 %v475_v18  ;;  %v416_v58 = vld [vmem:[#allocation8 + $0x348] sm:$0xff]  ;;  %v551_v63 = vld [vmem:[#allocation8 + $0x780] sm:$0xff] }
  0xba   :  { %948 = vmatpush1.msra.mxu0 %v343_v0  ;;  %1024 = vmatprep.subr.mxu1 %v472_v21  ;;  %v556_v59 = vld [vmem:[#allocation8 + $0x7a8] sm:$0xff]  ;;  %v539_v15 = vld [vmem:[#allocation8 + $0x720] sm:$0xff] }
  0xbb   :  { %949 = vmatprep.subr.mxu0 %v340_v4  ;;  %1025 = vmatpush1.msra.mxu1 %v471_v23  ;;  %v412_v60 = vld [vmem:[#allocation8 + $0x328] sm:$0xff]  ;;  %v407_v4 = vld [vmem:[#allocation8 + $0x300] sm:$0xff] }
  0xbc   :  { %950 = vmatpush1.msra.mxu0 %v339_v6  ;;  %1026 = vmatprep.subr.mxu1 %v468_v25  ;;  %v552_v61 = vld [vmem:[#allocation8 + $0x788] sm:$0xff]  ;;  %v535_v21 = vld [vmem:[#allocation8 + $0x700] sm:$0xff] }
  0xbd   :  { %951 = vmatprep.subr.mxu0 %v336_v8  ;;  %1027 = vmatpush1.msra.mxu1 %v467_v27  ;;  %v408_v0 = vld [vmem:[#allocation8 + $0x308] sm:$0xff]  ;;  %v403_v8 = vld [vmem:[#allocation8 + $0x2e0] sm:$0xff] }
  0xbe   :  { %952 = vmatpush1.msra.mxu0 %v335_v11  ;;  %1028 = vmatprep.subr.mxu1 %v464_v29  ;;  %v548_v2 = vld [vmem:[#allocation8 + $0x768] sm:$0xff]  ;;  %v531_v25 = vld [vmem:[#allocation8 + $0x6e0] sm:$0xff] }
  0xbf   :  { %953 = vmatprep.subr.mxu0 %v332_v13  ;;  %1029 = vmatpush1.msra.mxu1 %v463_v31  ;;  %v404_v6 = vld [vmem:[#allocation8 + $0x2e8] sm:$0xff]  ;;  %v399_v13 = vld [vmem:[#allocation8 + $0x2c0] sm:$0xff] }
  0xc0   :  { %954 = vmatpush1.msra.mxu0 %v331_v17  ;;  %1030 = vmatprep.subr.mxu1 %v460_v33  ;;  %v544_v7 = vld [vmem:[#allocation8 + $0x748] sm:$0xff]  ;;  %v527_v29 = vld [vmem:[#allocation8 + $0x6c0] sm:$0xff] }
  0xc1   :  { %955 = vmatprep.subr.mxu0 %v328_v20  ;;  %1031 = vmatpush1.msra.mxu1 %v459_v36  ;;  %v400_v11 = vld [vmem:[#allocation8 + $0x2c8] sm:$0xff]  ;;  %v395_v20 = vld [vmem:[#allocation8 + $0x2a0] sm:$0xff] }
  0xc2   :  { %956 = vmatpush1.msra.mxu0 %v327_v22  ;;  %1032 = vmatprep.subr.mxu1 %v456_v38  ;;  %v540_v12 = vld [vmem:[#allocation8 + $0x728] sm:$0xff]  ;;  %v383_v33 = vld [vmem:[#allocation8 + $0x240] sm:$0xff] }
  0xc3   :  { %957 = vmatprep.subr.mxu0 %v324_v24  ;;  %1033 = vmatpush1.msra.mxu1 %v455_v39  ;;  %v396_v17 = vld [vmem:[#allocation8 + $0x2a8] sm:$0xff]  ;;  %v391_v24 = vld [vmem:[#allocation8 + $0x280] sm:$0xff] }
  0xc4   :  { %958 = vmatpush1.msra.mxu0 %v323_v26  ;;  %1034 = vmatprep.subr.mxu1 %v452_v41  ;;  %v536_v18 = vld [vmem:[#allocation8 + $0x708] sm:$0xff]  ;;  %v379_v38 = vld [vmem:[#allocation8 + $0x220] sm:$0xff] }
  0xc5   :  { %959 = vmatprep.subr.mxu0 %v320_v28  ;;  %1035 = vmatpush1.msra.mxu1 %v451_v43  ;;  %v392_v22 = vld [vmem:[#allocation8 + $0x288] sm:$0xff]  ;;  %v387_v28 = vld [vmem:[#allocation8 + $0x260] sm:$0xff] }
  0xc6   :  { %960 = vmatpush1.msra.mxu0 %v319_v30  ;;  %1036 = vmatprep.subr.mxu1 %v448_v45  ;;  %v532_v23 = vld [vmem:[#allocation8 + $0x6e8] sm:$0xff]  ;;  %v519_v41 = vld [vmem:[#allocation8 + $0x680] sm:$0xff] }
  0xc7   :  { %961 = vmatprep.subr.mxu0 %v316_v35  ;;  %1037 = vmatpush1.msra.mxu1 %v447_v47  ;;  %v388_v26 = vld [vmem:[#allocation8 + $0x268] sm:$0xff]  ;;  %v523_v35 = vld [vmem:[#allocation8 + $0x6a0] sm:$0xff] }
  0xc8   :  { %962 = vmatpush1.msra.mxu0 %v315_v37  ;;  %1038 = vmatprep.subr.mxu1 %v444_v49  ;;  %v528_v27 = vld [vmem:[#allocation8 + $0x6c8] sm:$0xff] }
  0xc9   :  { %963 = vmatprep.subr.mxu0 %v312_v40  ;;  %1039 = vmatpush1.msra.mxu1 %v443_v51  ;;  %v384_v30 = vld [vmem:[#allocation8 + $0x248] sm:$0xff]  ;;  %v375_v40 = vld [vmem:[#allocation8 + $0x200] sm:$0xff]  ;;  %v502_v51 = vld [vmem:[#allocation8 + $0x5f8] sm:$0xff] }
  0xca   :  { %964 = vmatpush1.msra.mxu0 %v311_v42  ;;  %1040 = vmatprep.subr.mxu1 %v440_v53  ;;  %v524_v31 = vld [vmem:[#allocation8 + $0x6a8] sm:$0xff]  ;;  %v374_v42 = vld [vmem:[#allocation8 + $0x1f8] sm:$0xff] }
  0xcb   :  { %965 = vmatprep.subr.mxu0 %v436_v44  ;;  %1041 = vmatpush1.msra.mxu1 %v439_v1  ;;  %v380_v36 = vld [vmem:[#allocation8 + $0x228] sm:$0xff]  ;;  %v515_v44 = vld [vmem:[#allocation8 + $0x660] sm:$0xff]  ;;  %v1667_v1 = vld [vmem:[#allocation7] sm:$0xf] }
  0xcc   :  { %966 = vmatpush2.msra.mxu0 %v435_v46  ;;  %1042 = vmatprep.subr.mxu1 %v564_v32  ;;  %v520_v37 = vld [vmem:[#allocation8 + $0x688] sm:$0xff]  ;;  %v511_v46 = vld [vmem:[#allocation8 + $0x640] sm:$0xff] }
  0xcd   :  { %967 = vmatprep.subr.mxu0 %v432_v48  ;;  %1043 = vmatpush2.msra.mxu1 %v563_v3  ;;  %v376_v39 = vld [vmem:[#allocation8 + $0x208] sm:$0xff]  ;;  %v507_v48 = vld [vmem:[#allocation8 + $0x620] sm:$0xff] }
  0xce   :  { %968 = vmatpush2.msra.mxu0 %v431_v50  ;;  %1044 = vmatprep.subr.mxu1 %v560_v56  ;;  %v516_v43 = vld [vmem:[#allocation8 + $0x668] sm:$0xff]  ;;  %v503_v50 = vld [vmem:[#allocation8 + $0x600] sm:$0xff] }
  0xcf   :  { %969 = vmatprep.subr.mxu0 %v428_v52  ;;  %1045 = vmatpush2.msra.mxu1 %v559_v57  ;;  %v512_v45 = vld [vmem:[#allocation8 + $0x648] sm:$0xff]  ;;  %v569_v52 = vlaneseq }
  0xd0   :  { %970 = vmatpush2.msra.mxu0 %v427_v54  ;;  %1046 = vmatprep.subr.mxu1 %v556_v59  ;;  %v508_v47 = vld [vmem:[#allocation8 + $0x628] sm:$0xff] }
  0xd1   :  { %971 = vmatprep.subr.mxu0 %v424_v55  ;;  %1047 = vmatpush2.msra.mxu1 %v555_v19  ;;  %v504_v49 = vld [vmem:[#allocation8 + $0x608] sm:$0xff]  ;;  %v1664_v53 = vshrl.u32 %v569_v52, 7  ;;  %v426_v52 = vld [vmem:[#allocation8 + $0x398] sm:$0xff] }
  0xd2   :  { %972 = vmatpush2.msra.mxu0 %v423_v34  ;;  %1048 = vmatprep.subr.mxu1 %v552_v61 }
  0xd3   :  { %973 = vmatprep.subr.mxu0 %v420_v10  ;;  %1049 = vmatpush2.msra.mxu1 %v551_v63  ;;  %v571_v54 = vsub.s32 0, %v1664_v53  ;;  %v575_v55 = vsub.s32 1, %v1664_v53 }
  0xd4   :  { %974 = vmatpush2.msra.mxu0 %v419_v16  ;;  %1050 = vmatprep.subr.mxu1 %v548_v2  ;;  %v373_v2 = vld [vmem:[#allocation8 + $0x1f0] sm:$0xff] }
  0xd5   :  { %975 = vmatprep.subr.mxu0 %v416_v58  ;;  %1051 = vmatpush2.msra.mxu1 %v547_v5  ;;  %v572_v32 = vrot.slane %v1667_v1, %v571_v54  ;;  %v576_v34 = vrot.slane %v1667_v1, %v575_v55 }
  0xd6   :  { %976 = vmatpush2.msra.mxu0 %v415_v14  ;;  %1052 = vmatprep.subr.mxu1 %v544_v7 }
  0xd7   :  { %977 = vmatprep.subr.mxu0 %v412_v60  ;;  %1053 = vmatpush2.msra.mxu1 %v543_v9 }
  0xd8   :  { %978 = vmatpush2.msra.mxu0 %v411_v62  ;;  %1054 = vmatprep.subr.mxu1 %v540_v12  ;;  %v366_v12 = vld [vmem:[#allocation8 + $0x1b8] sm:$0xff] }
  0xd9   :  { %979 = vmatprep.subr.mxu0 %v408_v0  ;;  %1055 = vmatpush2.msra.mxu1 %v539_v15 }
  0xda   :  { %980 = vmatpush2.msra.mxu0 %v407_v4  ;;  %1056 = vmatprep.subr.mxu1 %v536_v18  ;;  %v361_v18 = vld [vmem:[#allocation8 + $0x190] sm:$0xff] }
  0xdb   :  { %981 = vmatprep.subr.mxu0 %v404_v6  ;;  %1057 = vmatpush2.msra.mxu1 %v535_v21  ;;  %v370_v6 = vld [vmem:[#allocation8 + $0x1d8] sm:$0xff]  ;;  %v357_v21 = vld [vmem:[#allocation8 + $0x170] sm:$0xff] }
  0xdc   :  { %982 = vmatpush2.msra.mxu0 %v403_v8  ;;  %1058 = vmatprep.subr.mxu1 %v532_v23  ;;  %v369_v8 = vld [vmem:[#allocation8 + $0x1d0] sm:$0xff] }
  0xdd   :  { %983 = vmatprep.subr.mxu0 %v400_v11  ;;  %1059 = vmatpush2.msra.mxu1 %v531_v25  ;;  %v353_v23 = vld [vmem:[#allocation8 + $0x150] sm:$0xff] }
  0xde   :  { %984 = vmatpush2.msra.mxu0 %v399_v13  ;;  %1060 = vmatprep.subr.mxu1 %v528_v27  ;;  %v365_v13 = vld [vmem:[#allocation8 + $0x1b0] sm:$0xff] }
  0xdf   :  { %985 = vmatprep.subr.mxu0 %v396_v17  ;;  %1061 = vmatpush2.msra.mxu1 %v527_v29  ;;  %v362_v17 = vld [vmem:[#allocation8 + $0x198] sm:$0xff]  ;;  %v349_v25 = vld [vmem:[#allocation8 + $0x130] sm:$0xff] }
  0xe0   :  { %986 = vmatpush2.msra.mxu0 %v395_v20  ;;  %1062 = vmatprep.subr.mxu1 %v524_v31  ;;  %v358_v20 = vld [vmem:[#allocation8 + $0x178] sm:$0xff]  ;;  %v345_v27 = vld [vmem:[#allocation8 + $0x110] sm:$0xff] }
  0xe1   :  { %987 = vmatprep.subr.mxu0 %v392_v22  ;;  %1063 = vmatpush2.msra.mxu1 %v523_v35  ;;  %v354_v22 = vld [vmem:[#allocation8 + $0x158] sm:$0xff]  ;;  %v341_v29 = vld [vmem:[#allocation8 + $0xf0] sm:$0xff] }
  0xe2   :  { %988 = vmatpush2.msra.mxu0 %v391_v24  ;;  %1064 = vmatprep.subr.mxu1 %v520_v37  ;;  %v350_v24 = vld [vmem:[#allocation8 + $0x138] sm:$0xff]  ;;  %v337_v31 = vld [vmem:[#allocation8 + $0xd0] sm:$0xff] }
  0xe3   :  { %989 = vmatprep.subr.mxu0 %v388_v26  ;;  %1065 = vmatpush2.msra.mxu1 %v519_v41  ;;  %v346_v26 = vld [vmem:[#allocation8 + $0x118] sm:$0xff]  ;;  %v333_v35 = vld [vmem:[#allocation8 + $0xb0] sm:$0xff] }
  0xe4   :  { %990 = vmatpush2.msra.mxu0 %v387_v28  ;;  %1066 = vmatprep.subr.mxu1 %v516_v43  ;;  %v342_v28 = vld [vmem:[#allocation8 + $0xf8] sm:$0xff]  ;;  %v329_v37 = vld [vmem:[#allocation8 + $0x90] sm:$0xff] }
  0xe5   :  { %991 = vmatprep.subr.mxu0 %v384_v30  ;;  %1067 = vmatpush2.msra.mxu1 %v515_v44  ;;  %v338_v30 = vld [vmem:[#allocation8 + $0xd8] sm:$0xff]  ;;  %v321_v41 = vld [vmem:[#allocation8 + $0x50] sm:$0xff] }
  0xe6   :  { %992 = vmatpush2.msra.mxu0 %v383_v33  ;;  %1068 = vmatprep.subr.mxu1 %v512_v45  ;;  %v334_v33 = vld [vmem:[#allocation8 + $0xb8] sm:$0xff]  ;;  %v317_v43 = vld [vmem:[#allocation8 + $0x30] sm:$0xff] }
  0xe7   :  { %993 = vmatprep.subr.mxu0 %v380_v36  ;;  %1069 = vmatpush2.msra.mxu1 %v511_v46  ;;  %v330_v36 = vld [vmem:[#allocation8 + $0x98] sm:$0xff]  ;;  %v313_v45 = vld [vmem:[#allocation8 + $0x10] sm:$0xff] }
  0xe8   :  { %994 = vmatpush2.msra.mxu0 %v379_v38  ;;  %1070 = vmatprep.subr.mxu1 %v508_v47  ;;  %v326_v38 = vld [vmem:[#allocation8 + $0x78] sm:$0xff]  ;;  %v437_v47 = vld [vmem:[#allocation8 + $0x3f0] sm:$0xff] }
  0xe9   :  { %995 = vmatprep.subr.mxu0 %v376_v39  ;;  %1071 = vmatpush2.msra.mxu1 %v507_v48  ;;  %v325_v39 = vld [vmem:[#allocation8 + $0x70] sm:$0xff]  ;;  %v314_v44 = vld [vmem:[#allocation8 + $0x18] sm:$0xff] }
  0xea   :  { %996 = vmatpush2.msra.mxu0 %v375_v40  ;;  %1072 = vmatprep.subr.mxu1 %v504_v49  ;;  %v322_v40 = vld [vmem:[#allocation8 + $0x58] sm:$0xff]  ;;  %v433_v49 = vld [vmem:[#allocation8 + $0x3d0] sm:$0xff] }
  0xeb   :  { %1087 = vmatprep.subr.mxu0 %v374_v42  ;;  %1073 = vmatpush2.msra.mxu1 %v503_v50  ;;  %v318_v42 = vld [vmem:[#allocation8 + $0x38] sm:$0xff] }
  0xec   :  { %1164 = vmatprep.subr.mxu1 %v502_v51  ;;  %v438_v46 = vld [vmem:[#allocation8 + $0x3f8] sm:$0xff]  ;;  %v429_v51 = vld [vmem:[#allocation8 + $0x3b0] sm:$0xff] }
  0xed   :  { %v434_v48 = vld [vmem:[#allocation8 + $0x3d8] sm:$0xff] }
  0xee   :  { %v430_v50 = vld [vmem:[#allocation8 + $0x3b8] sm:$0xff] }
 0x124   :  { %v739_v3 = vpop.f32.mrf.mxu1 }
 0x126   :  { %v741_v59 = vpop.f32.mrf.mxu1 }
 0x135   :  { %v662_v10 = vpop.f32.mrf.mxu0 }
 0x136   :  { %v663_v56 = vadd.f32 %v662_v10, %v572_v32  ;;  %v583_v10 = vsub.s32 3, %v1664_v53 }
 0x137   :  { %v664_v16 = vpop.f32.mrf.mxu0 }
 0x138   :  { %v740_v57 = vadd.f32 %v739_v3, %v663_v56  ;;  %v665_v58 = vadd.f32 %v664_v16, %v576_v34  ;;  %v422_v3 = vld [vmem:[#allocation8 + $0x378] sm:$0xff]  ;;  %v421_v56 = vld [vmem:[#allocation8 + $0x370] sm:$0xff] }
 0x13a   :  { %v1676_v14 = vmax.f32 %v740_v57, 0.0  ;;  %v742_v19 = vadd.f32 %v741_v59, %v665_v58  ;;  %v668_v60 = vpop.f32.mrf.mxu0  ;;  %v418_v57 = vld [vmem:[#allocation8 + $0x358] sm:$0xff]  ;;  %v417_v58 = vld [vmem:[#allocation8 + $0x350] sm:$0xff]  ;;  %v584_v59 = vrot.slane %v1667_v1, %v583_v10 }
 0x13b   :  { %v669_v62 = vadd.f32 %v668_v60, %v572_v32  ;;  %v579_v32 = vsub.s32 2, %v1664_v53 }
 0x13c   :  { %1241 = vst [vmem:[#allocation10] sm:$0xff] %v1676_v14  ;;  %v905_v61 = vmax.f32 %v742_v19, 0.0  ;;  %v670_v63 = vpop.f32.mrf.mxu0  ;;  %v414_v19 = vld [vmem:[#allocation8 + $0x338] sm:$0xff] }
 0x13d   :  { %v745_v0 = vpop.f32.mrf.mxu1  ;;  %v671_v4 = vadd.f32 %v670_v63, %v576_v34  ;;  %v425_v34 = vld [vmem:[#allocation8 + $0x390] sm:$0xff]  ;;  %v580_v16 = vrot.slane %v1667_v1, %v579_v32 }
 0x13e   :  { %1242 = vst [vmem:[#allocation10 + $0x8] sm:$0xff] %v905_v61  ;;  %v746_v5 = vadd.f32 %v745_v0, %v669_v62  ;;  %997 = vmatprep.mubr.f32.mxu0 %v905_v61  ;;  %v413_v62 = vld [vmem:[#allocation8 + $0x330] sm:$0xff]  ;;  %v410_v0 = vld [vmem:[#allocation8 + $0x318] sm:$0xff] }
 0x13f   :  { %v747_v7 = vpop.f32.mrf.mxu1  ;;  %998 = vmatmul.mubr.f32.vlgmr.msra.gmra.mxu0 %v1676_v14  ;;  %v405_v1 = vld [vmem:[#allocation8 + $0x2f0] sm:$0xff] }
 0x140   :  { %v1680_v9 = vmax.f32 %v746_v5, 0.0  ;;  %v748_v11 = vadd.f32 %v747_v7, %v671_v4  ;;  %1088 = vmatpush1.msra.mxu0 %v373_v2  ;;  %v409_v5 = vld [vmem:[#allocation8 + $0x310] sm:$0xff] }
 0x141   :  { %1089 = vmatprep.subr.mxu0 %v370_v6 }
 0x142   :  { %1245 = vst [vmem:[#allocation10 + $0x20] sm:$0xff] %v1680_v9  ;;  %v1683_v15 = vmax.f32 %v748_v11, 0.0  ;;  %1090 = vmatpush1.msra.mxu0 %v369_v8  ;;  %v406_v8 = vld [vmem:[#allocation8 + $0x2f8] sm:$0xff] }
 0x143   :  { %1091 = vmatprep.subr.mxu0 %v366_v12 }
 0x144   :  { %1246 = vst [vmem:[#allocation10 + $0x28] sm:$0xff] %v1683_v15  ;;  %1003 = vmatprep.mubr.f32.mxu0 %v1683_v15  ;;  %1092 = vmatpush1.msra.mxu0 %v365_v13 }
 0x145   :  { %1004 = vmatmul.mubr.f32.gmra.mxu0 %v1680_v9  ;;  %1093 = vmatprep.subr.mxu0 %v362_v17 }
 0x146   :  { %1151 = vmatprep.mubr.f32.mxu0 %v905_v61  ;;  %1094 = vmatpush1.msra.mxu0 %v361_v18 }
 0x147   :  { %1095 = vmatprep.subr.mxu0 %v358_v20  ;;  %v402_v20 = vld [vmem:[#allocation8 + $0x2d8] sm:$0xff] }
 0x148   :  { %1096 = vmatpush1.msra.mxu0 %v357_v21 }
 0x149   :  { %1097 = vmatprep.subr.mxu0 %v354_v22 }
 0x14a   :  { %1098 = vmatpush1.msra.mxu0 %v353_v23  ;;  %v401_v23 = vld [vmem:[#allocation8 + $0x2d0] sm:$0xff] }
 0x14b   :  { %1099 = vmatprep.subr.mxu0 %v350_v24 }
 0x14c   :  { %1100 = vmatpush1.msra.mxu0 %v349_v25 }
 0x14d   :  { %1101 = vmatprep.subr.mxu0 %v346_v26 }
 0x14e   :  { %1102 = vmatpush1.msra.mxu0 %v345_v27  ;;  %v398_v27 = vld [vmem:[#allocation8 + $0x2b8] sm:$0xff] }
 0x14f   :  { %1103 = vmatprep.subr.mxu0 %v342_v28  ;;  %v501_v28 = vld [vmem:[#allocation8 + $0x5f0] sm:$0xff] }
 0x150   :  { %1104 = vmatpush1.msra.mxu0 %v341_v29  ;;  %v397_v29 = vld [vmem:[#allocation8 + $0x2b0] sm:$0xff] }
 0x151   :  { %1105 = vmatprep.subr.mxu0 %v338_v30 }
 0x152   :  { %1106 = vmatpush1.msra.mxu0 %v337_v31 }
 0x153   :  { %1107 = vmatprep.subr.mxu0 %v334_v33  ;;  %v498_v33 = vld [vmem:[#allocation8 + $0x5d8] sm:$0xff] }
 0x154   :  { %1108 = vmatpush1.msra.mxu0 %v333_v35  ;;  %v394_v35 = vld [vmem:[#allocation8 + $0x298] sm:$0xff] }
 0x155   :  { %1109 = vmatprep.subr.mxu0 %v330_v36  ;;  %v497_v36 = vld [vmem:[#allocation8 + $0x5d0] sm:$0xff] }
 0x156   :  { %1110 = vmatpush1.msra.mxu0 %v329_v37 }
 0x157   :  { %1111 = vmatprep.subr.mxu0 %v326_v38  ;;  %v494_v38 = vld [vmem:[#allocation8 + $0x5b8] sm:$0xff] }
 0x158   :  { %1112 = vmatpush1.msra.mxu0 %v325_v39  ;;  %v493_v39 = vld [vmem:[#allocation8 + $0x5b0] sm:$0xff] }
 0x159   :  { %1113 = vmatprep.subr.mxu0 %v322_v40  ;;  %v490_v40 = vld [vmem:[#allocation8 + $0x598] sm:$0xff] }
 0x15a   :  { %1114 = vmatpush1.msra.mxu0 %v321_v41  ;;  %v393_v41 = vld [vmem:[#allocation8 + $0x290] sm:$0xff] }
 0x15b   :  { %1115 = vmatprep.subr.mxu0 %v318_v42  ;;  %v489_v42 = vld [vmem:[#allocation8 + $0x590] sm:$0xff] }
 0x15c   :  { %1116 = vmatpush1.msra.mxu0 %v317_v43  ;;  %v390_v43 = vld [vmem:[#allocation8 + $0x278] sm:$0xff] }
 0x15d   :  { %1117 = vmatprep.subr.mxu0 %v314_v44  ;;  %v486_v44 = vld [vmem:[#allocation8 + $0x578] sm:$0xff] }
 0x15e   :  { %1118 = vmatpush1.msra.mxu0 %v313_v45  ;;  %v389_v45 = vld [vmem:[#allocation8 + $0x270] sm:$0xff] }
 0x15f   :  { %1119 = vmatprep.subr.mxu0 %v438_v46  ;;  %v485_v46 = vld [vmem:[#allocation8 + $0x570] sm:$0xff] }
 0x160   :  { %1120 = vmatpush2.msra.mxu0 %v437_v47  ;;  %v386_v47 = vld [vmem:[#allocation8 + $0x258] sm:$0xff] }
 0x161   :  { %1121 = vmatprep.subr.mxu0 %v434_v48  ;;  %v482_v48 = vld [vmem:[#allocation8 + $0x558] sm:$0xff] }
 0x162   :  { %1122 = vmatpush2.msra.mxu0 %v433_v49  ;;  %v385_v49 = vld [vmem:[#allocation8 + $0x250] sm:$0xff] }
 0x163   :  { %1123 = vmatprep.subr.mxu0 %v430_v50  ;;  %v481_v50 = vld [vmem:[#allocation8 + $0x550] sm:$0xff] }
 0x164   :  { %1124 = vmatpush2.msra.mxu0 %v429_v51  ;;  %v382_v51 = vld [vmem:[#allocation8 + $0x238] sm:$0xff] }
 0x165   :  { %1125 = vmatprep.subr.mxu0 %v426_v52  ;;  %v478_v52 = vld [vmem:[#allocation8 + $0x538] sm:$0xff] }
 0x166   :  { %1126 = vmatpush2.msra.mxu0 %v425_v34  ;;  %v381_v34 = vld [vmem:[#allocation8 + $0x230] sm:$0xff] }
 0x167   :  { %1127 = vmatprep.subr.mxu0 %v422_v3  ;;  %v477_v3 = vld [vmem:[#allocation8 + $0x530] sm:$0xff] }
 0x168   :  { %1128 = vmatpush2.msra.mxu0 %v421_v56  ;;  %v816_v60 = vpop.f32.mrf.mxu1  ;;  %v378_v56 = vld [vmem:[#allocation8 + $0x218] sm:$0xff] }
 0x169   :  { %v893_v61 = vpop.f32.mrf.mxu0  ;;  %1129 = vmatprep.subr.mxu0 %v418_v57  ;;  %v817_v63 = vadd.f32 %v816_v60, %v580_v16  ;;  %v377_v57 = vld [vmem:[#allocation8 + $0x210] sm:$0xff]  ;;  %v466_v60 = vld [vmem:[#allocation8 + $0x4d8] sm:$0xff] }
 0x16a   :  { %1130 = vmatpush2.msra.mxu0 %v417_v58  ;;  %v818_v2 = vpop.f32.mrf.mxu1  ;;  %v473_v58 = vld [vmem:[#allocation8 + $0x510] sm:$0xff] }
 0x16b   :  { %v895_v4 = vpop.f32.mrf.mxu0  ;;  %1131 = vmatprep.subr.mxu0 %v414_v19  ;;  %v894_v6 = vadd.f32 %v893_v61, %v817_v63  ;;  %v819_v7 = vadd.f32 %v818_v2, %v584_v59  ;;  %v469_v19 = vld [vmem:[#allocation8 + $0x4f0] sm:$0xff] }
 0x16c   :  { %1132 = vmatpush2.msra.mxu0 %v413_v62  ;;  %v465_v61 = vld [vmem:[#allocation8 + $0x4d0] sm:$0xff]  ;;  %v462_v62 = vld [vmem:[#allocation8 + $0x4b8] sm:$0xff] }
 0x16d   :  { %v822_v11 = vpop.f32.mrf.mxu1  ;;  %v899_v12 = vpop.f32.mrf.mxu0  ;;  %1133 = vmatprep.subr.mxu0 %v410_v0  ;;  %v1696_v13 = vmax.f32 %v894_v6, 0.0  ;;  %v896_v17 = vadd.f32 %v895_v4, %v819_v7  ;;  %v461_v63 = vld [vmem:[#allocation8 + $0x4b0] sm:$0xff]  ;;  %v458_v0 = vld [vmem:[#allocation8 + $0x498] sm:$0xff] }
 0x16e   :  { %v823_v18 = vadd.f32 %v822_v11, %v580_v16  ;;  %1134 = vmatpush2.msra.mxu0 %v409_v5  ;;  %v474_v16 = vld [vmem:[#allocation8 + $0x518] sm:$0xff]  ;;  %v457_v2 = vld [vmem:[#allocation8 + $0x490] sm:$0xff] }
 0x16f   :  { %v824_v21 = vpop.f32.mrf.mxu1  ;;  %v901_v22 = vpop.f32.mrf.mxu0  ;;  %1135 = vmatprep.subr.mxu0 %v406_v8  ;;  %1243 = vst [vmem:[#allocation10 + $0x10] sm:$0xff] %v1696_v13  ;;  %v907_v24 = vmax.f32 %v896_v17, 0.0  ;;  %v454_v4 = vld [vmem:[#allocation8 + $0x478] sm:$0xff]  ;;  %v453_v5 = vld [vmem:[#allocation8 + $0x470] sm:$0xff] }
 0x170   :  { %v825_v25 = vadd.f32 %v824_v21, %v584_v59  ;;  %v900_v26 = vadd.f32 %v899_v12, %v823_v18  ;;  %1136 = vmatpush2.msra.mxu0 %v405_v1  ;;  %v470_v59 = vld [vmem:[#allocation8 + $0x4f8] sm:$0xff]  ;;  %v449_v6 = vld [vmem:[#allocation8 + $0x450] sm:$0xff] }
 0x171   :  { %1137 = vmatprep.subr.mxu0 %v402_v20  ;;  %1244 = vst [vmem:[#allocation10 + $0x18] sm:$0xff] %v907_v24  ;;  %1074 = vmatprep.mubr.f32.mxu1 %v907_v24  ;;  %v445_v7 = vld [vmem:[#allocation8 + $0x430] sm:$0xff]  ;;  %v442_v8 = vld [vmem:[#allocation8 + $0x418] sm:$0xff] }
 0x172   :  { %v1699_v30 = vmax.f32 %v900_v26, 0.0  ;;  %v902_v31 = vadd.f32 %v901_v22, %v825_v25  ;;  %1138 = vmatpush2.msra.mxu0 %v401_v23  ;;  %1075 = vmatmul.mubr.f32.vlgmr.msra.gmra.mxu1 %v1696_v13  ;;  %v441_v11 = vld [vmem:[#allocation8 + $0x410] sm:$0xff]  ;;  %v562_v1 = vld [vmem:[#allocation8 + $0x7d8] sm:$0xff] }
 0x173   :  { %1139 = vmatprep.subr.mxu0 %v398_v27  ;;  %1165 = vmatpush1.msra.mxu1 %v501_v28  ;;  %v565_v12 = vld [vmem:[#allocation8 + $0x7f0] sm:$0xff]  ;;  %v558_v18 = vld [vmem:[#allocation8 + $0x7b8] sm:$0xff] }
 0x174   :  { %1247 = vst [vmem:[#allocation10 + $0x30] sm:$0xff] %v1699_v30  ;;  %v1703_v37 = vmax.f32 %v902_v31, 0.0  ;;  %1140 = vmatpush2.msra.mxu0 %v397_v29  ;;  %1166 = vmatprep.subr.mxu1 %v498_v33  ;;  %v561_v17 = vld [vmem:[#allocation8 + $0x7d0] sm:$0xff]  ;;  %v554_v21 = vld [vmem:[#allocation8 + $0x798] sm:$0xff] }
 0x175   :  { %1141 = vmatprep.subr.mxu0 %v394_v35  ;;  %1167 = vmatpush1.msra.mxu1 %v497_v36  ;;  %v557_v20 = vld [vmem:[#allocation8 + $0x7b0] sm:$0xff]  ;;  %v550_v23 = vld [vmem:[#allocation8 + $0x778] sm:$0xff] }
 0x176   :  { %1248 = vst [vmem:[#allocation10 + $0x38] sm:$0xff] %v1703_v37  ;;  %1080 = vmatprep.mubr.f32.mxu1 %v1703_v37  ;;  %1168 = vmatprep.subr.mxu1 %v494_v38  ;;  %v553_v22 = vld [vmem:[#allocation8 + $0x790] sm:$0xff]  ;;  %v546_v25 = vld [vmem:[#allocation8 + $0x758] sm:$0xff] }
 0x177   :  { %1081 = vmatmul.mubr.f32.gmra.mxu1 %v1699_v30  ;;  %1142 = vmatpush2.msra.mxu0 %v393_v41  ;;  %v545_v26 = vld [vmem:[#allocation8 + $0x750] sm:$0xff]  ;;  %v542_v27 = vld [vmem:[#allocation8 + $0x738] sm:$0xff] }
 0x178   :  { %1169 = vmatpush1.msra.mxu1 %v493_v39  ;;  %1228 = vmatprep.mubr.f32.mxu1 %v907_v24  ;;  %v549_v24 = vld [vmem:[#allocation8 + $0x770] sm:$0xff]  ;;  %v538_v29 = vld [vmem:[#allocation8 + $0x718] sm:$0xff] }
 0x179   :  { %1170 = vmatprep.subr.mxu1 %v490_v40  ;;  %1143 = vmatprep.subr.mxu0 %v390_v43  ;;  %v541_v28 = vld [vmem:[#allocation8 + $0x730] sm:$0xff]  ;;  %v534_v33 = vld [vmem:[#allocation8 + $0x6f8] sm:$0xff] }
 0x17a   :  { %1171 = vmatpush1.msra.mxu1 %v489_v42  ;;  %1144 = vmatpush2.msra.mxu0 %v389_v45  ;;  %v537_v31 = vld [vmem:[#allocation8 + $0x710] sm:$0xff]  ;;  %v530_v36 = vld [vmem:[#allocation8 + $0x6d8] sm:$0xff] }
 0x17b   :  { %1172 = vmatprep.subr.mxu1 %v486_v44  ;;  %1145 = vmatprep.subr.mxu0 %v386_v47  ;;  %v533_v35 = vld [vmem:[#allocation8 + $0x6f0] sm:$0xff]  ;;  %v526_v39 = vld [vmem:[#allocation8 + $0x6b8] sm:$0xff] }
 0x17c   :  { %1173 = vmatpush1.msra.mxu1 %v485_v46  ;;  %1146 = vmatpush2.msra.mxu0 %v385_v49  ;;  %v529_v38 = vld [vmem:[#allocation8 + $0x6d0] sm:$0xff]  ;;  %v522_v41 = vld [vmem:[#allocation8 + $0x698] sm:$0xff] }
 0x17d   :  { %1174 = vmatprep.subr.mxu1 %v482_v48  ;;  %1147 = vmatprep.subr.mxu0 %v382_v51  ;;  %v525_v40 = vld [vmem:[#allocation8 + $0x6b0] sm:$0xff]  ;;  %v518_v43 = vld [vmem:[#allocation8 + $0x678] sm:$0xff] }
 0x17e   :  { %1175 = vmatpush1.msra.mxu1 %v481_v50  ;;  %1148 = vmatpush2.msra.mxu0 %v381_v34  ;;  %v521_v42 = vld [vmem:[#allocation8 + $0x690] sm:$0xff]  ;;  %v514_v45 = vld [vmem:[#allocation8 + $0x658] sm:$0xff] }
 0x17f   :  { %1176 = vmatprep.subr.mxu1 %v478_v52  ;;  %1149 = vmatprep.subr.mxu0 %v378_v56  ;;  %v517_v44 = vld [vmem:[#allocation8 + $0x670] sm:$0xff]  ;;  %v510_v47 = vld [vmem:[#allocation8 + $0x638] sm:$0xff] }
 0x180   :  { %1177 = vmatpush1.msra.mxu1 %v477_v3  ;;  %1150 = vmatpush2.msra.mxu0 %v377_v57  ;;  %v513_v46 = vld [vmem:[#allocation8 + $0x650] sm:$0xff]  ;;  %v506_v49 = vld [vmem:[#allocation8 + $0x618] sm:$0xff] }
 0x181   :  { %1178 = vmatprep.subr.mxu1 %v474_v16  ;;  %1152 = vmatmul.mubr.f32.vlgmr.msra.gmra.mxu0 %v1676_v14  ;;  %v450_v14 = vld [vmem:[#allocation8 + $0x458] sm:$0xff]  ;;  %v509_v48 = vld [vmem:[#allocation8 + $0x630] sm:$0xff] }
 0x182   :  { %1179 = vmatpush1.msra.mxu1 %v473_v58  ;;  %1157 = vmatprep.mubr.f32.mxu0 %v1683_v15  ;;  %v446_v15 = vld [vmem:[#allocation8 + $0x438] sm:$0xff]  ;;  %v505_v50 = vld [vmem:[#allocation8 + $0x610] sm:$0xff] }
 0x183   :  { %1180 = vmatprep.subr.mxu1 %v470_v59 }
 0x184   :  { %1181 = vmatpush1.msra.mxu1 %v469_v19 }
 0x185   :  { %1182 = vmatprep.subr.mxu1 %v466_v60  ;;  %1158 = vmatmul.mubr.f32.gmra.mxu0 %v1680_v9  ;;  %v566_v9 = vld [vmem:[#allocation8 + $0x7f8] sm:$0xff] }
 0x186   :  { %1183 = vmatpush1.msra.mxu1 %v465_v61 }
 0x187   :  { %1184 = vmatprep.subr.mxu1 %v462_v62 }
 0x188   :  { %1185 = vmatpush1.msra.mxu1 %v461_v63 }
 0x189   :  { %1186 = vmatprep.subr.mxu1 %v458_v0 }
 0x18a   :  { %1187 = vmatpush1.msra.mxu1 %v457_v2 }
 0x18b   :  { %1188 = vmatprep.subr.mxu1 %v454_v4 }
 0x18c   :  { %1189 = vmatpush1.msra.mxu1 %v453_v5 }
 0x18d   :  { %1190 = vmatprep.subr.mxu1 %v450_v14 }
 0x18e   :  { %1191 = vmatpush1.msra.mxu1 %v449_v6 }
 0x18f   :  { %1192 = vmatprep.subr.mxu1 %v446_v15 }
 0x190   :  { %1193 = vmatpush1.msra.mxu1 %v445_v7 }
 0x191   :  { %1194 = vmatprep.subr.mxu1 %v442_v8 }
 0x192   :  { %1195 = vmatpush1.msra.mxu1 %v441_v11 }
 0x193   :  { %1196 = vmatprep.subr.mxu1 %v566_v9 }
 0x194   :  { %1197 = vmatpush2.msra.mxu1 %v565_v12 }
 0x195   :  { %1198 = vmatprep.subr.mxu1 %v562_v1 }
 0x196   :  { %1199 = vmatpush2.msra.mxu1 %v561_v17 }
 0x197   :  { %1200 = vmatprep.subr.mxu1 %v558_v18 }
 0x198   :  { %1201 = vmatpush2.msra.mxu1 %v557_v20 }
 0x199   :  { %1202 = vmatprep.subr.mxu1 %v554_v21 }
 0x19a   :  { %1203 = vmatpush2.msra.mxu1 %v553_v22 }
 0x19b   :  { %1204 = vmatprep.subr.mxu1 %v550_v23 }
 0x19c   :  { %1205 = vmatpush2.msra.mxu1 %v549_v24 }
 0x19d   :  { %1206 = vmatprep.subr.mxu1 %v546_v25 }
 0x19e   :  { %1207 = vmatpush2.msra.mxu1 %v545_v26 }
 0x19f   :  { %1208 = vmatprep.subr.mxu1 %v542_v27 }
 0x1a0   :  { %1209 = vmatpush2.msra.mxu1 %v541_v28 }
 0x1a1   :  { %1210 = vmatprep.subr.mxu1 %v538_v29 }
 0x1a2   :  { %1211 = vmatpush2.msra.mxu1 %v537_v31 }
 0x1a3   :  { %1212 = vmatprep.subr.mxu1 %v534_v33 }
 0x1a4   :  { %1213 = vmatpush2.msra.mxu1 %v533_v35 }
 0x1a5   :  { %1214 = vmatprep.subr.mxu1 %v530_v36 }
 0x1a6   :  { %1215 = vmatpush2.msra.mxu1 %v529_v38 }
 0x1a7   :  { %1216 = vmatprep.subr.mxu1 %v526_v39 }
 0x1a8   :  { %1217 = vmatpush2.msra.mxu1 %v525_v40 }
 0x1a9   :  { %1218 = vmatprep.subr.mxu1 %v522_v41 }
 0x1aa   :  { %1219 = vmatpush2.msra.mxu1 %v521_v42 }
 0x1ab   :  { %1220 = vmatprep.subr.mxu1 %v518_v43 }
 0x1ac   :  { %1221 = vmatpush2.msra.mxu1 %v517_v44 }
 0x1ad   :  { %1222 = vmatprep.subr.mxu1 %v514_v45 }
 0x1ae   :  { %1223 = vmatpush2.msra.mxu1 %v513_v46 }
 0x1af   :  { %1224 = vmatprep.subr.mxu1 %v510_v47 }
 0x1b0   :  { %1225 = vmatpush2.msra.mxu1 %v509_v48 }
 0x1b1   :  { %1226 = vmatprep.subr.mxu1 %v506_v49 }
 0x1b2   :  { %1227 = vmatpush2.msra.mxu1 %v505_v50 }
 0x1b3   :  { %1229 = vmatmul.mubr.f32.vlgmr.msra.gmra.mxu1 %v1696_v13 }
 0x1b4   :  { %1234 = vmatprep.mubr.f32.mxu1 %v1703_v37 }
 0x1b7   :  { %1235 = vmatmul.mubr.f32.gmra.mxu1 %v1699_v30 }
 0x1b8   :  { %1499 = shalt.err (!%p1496_p10)
}
 0x1b9   :  { %1358 = dma.vmem_to_hbm [thread:$0]  %s1353_s3, 1024, %s1759_s5, [#allocation4], %s1560_s29, %s1560_s29, %s1561_s30   ;;  %vm1333_vm1 = vcmask 1040384   ;;  %vm1338_vm2 = vcmask 1041408  }
 0x1ba   :  { %v1723_v13 = vld [vmem:[%s1758_s4] sm:$0xf]  ;;  %s1565_s4 = smov [#allocation11]  }
 0x1bb   :  { %v916_v37 = vrot.slane %v1723_v13, %v571_v54  ;;  %v920_v52 = vrot.slane %v1723_v13, %v575_v55  ;;  %s1364_s5 = sshll.u32 %s1565_s4, 4  ;;  %s1365_s5 = int_to_ptr.vmem [resolvable:$true] %s1364_s5 }
 0x1bc   :  { %s1508_s26 = scalar_lea.vmem %s1365_s5, 1024  ;;  %p1513_p12 = scmp.lt.s32.totalorder %s1365_s5, %s1365_s5 }
 0x1bd   :  { %p1509_p11 = scmp.ne.s32.totalorder %s1365_s5, %s1508_s26  ;;  %p1514_p13 = scmp.lt.s32.totalorder %s1508_s26, %s1508_s26 }
 0x1bf   :  { %p1515_p0 = por %p1514_p13, %p1513_p12 }
 0x1c1   :  { %p1516_p1 = pnand %p1515_p0, %p1509_p11 }
 0x1ff   :  { %v999_v30 = vpop.f32.mrf.mxu0 }
 0x200   :  { %v1000_v3 = vadd.f32 %v999_v30, %v916_v37 }
 0x201   :  { %v1001_v51 = vpop.f32.mrf.mxu0 }
 0x202   :  { %v1002_v16 = vadd.f32 %v1001_v51, %v920_v52  ;;  %v924_v51 = vrot.slane %v1723_v13, %v579_v32 }
 0x205   :  { %v1005_v34 = vpop.f32.mrf.mxu0 }
 0x206   :  { %v1006_v19 = vadd.f32 %v1005_v34, %v916_v37 }
 0x207   :  { %v1007_v58 = vpop.f32.mrf.mxu0 }
 0x208   :  { %v1008_v62 = vadd.f32 %v1007_v58, %v920_v52  ;;  %v928_v52 = vrot.slane %v1723_v13, %v583_v10 }
 0x232   :  { %v1076_v56 = vpop.f32.mrf.mxu1 }
 0x233   :  { %v1077_v57 = vadd.f32 %v1076_v56, %v1000_v3 }
 0x234   :  { %v1078_v59 = vpop.f32.mrf.mxu1 }
 0x235   :  { %1249 = vst [vmem:[#allocation11] sm:$0xff] %v1077_v57  ;;  %v1079_v60 = vadd.f32 %v1078_v59, %v1002_v16 }
 0x237   :  { %v1082_v61 = vpop.f32.mrf.mxu1  ;;  %1250 = vst [vmem:[#allocation11 + $0x8] sm:$0xff] %v1079_v60 }
 0x238   :  { %v1083_v63 = vadd.f32 %v1082_v61, %v1006_v19 }
 0x239   :  { %v1084_v54 = vpop.f32.mrf.mxu1 }
 0x23a   :  { %1253 = vst [vmem:[#allocation11 + $0x20] sm:$0xff] %v1083_v63  ;;  %v1257_v0 = vadd.f32 %v1083_v63, %v1077_v57  ;;  %v1085_v2 = vadd.f32 %v1084_v54, %v1008_v62 }
 0x23c   :  { %v1258_v4 = vrot.slane %v1257_v0, 4  ;;  %1254 = vst [vmem:[#allocation11 + $0x28] sm:$0xff] %v1085_v2  ;;  %v1264_v55 = vadd.f32 %v1085_v2, %v1079_v60 }
 0x23e   :  { %v1259_v5 = vadd.f32 %v1258_v4, %v1257_v0  ;;  %v1265_v14 = vrot.slane %v1264_v55, 4 }
 0x240   :  { %v1260_v6 = vrot.slane %v1259_v5, 2  ;;  %v1266_v15 = vadd.f32 %v1265_v14, %v1264_v55 }
 0x241   :  { %v1153_v30 = vpop.f32.mrf.mxu0 }
 0x242   :  { %v1261_v7 = vadd.f32 %v1260_v6, %v1259_v5  ;;  %v1267_v8 = vrot.slane %v1266_v15, 2  ;;  %v1154_v3 = vadd.f32 %v1153_v30, %v924_v51 }
 0x243   :  { %v1155_v37 = vpop.f32.mrf.mxu0 }
 0x244   :  { %v1262_v11 = vrot.slane %v1261_v7, 1  ;;  %v1268_v9 = vadd.f32 %v1267_v8, %v1266_v15  ;;  %v1156_v16 = vadd.f32 %v1155_v37, %v928_v52 }
 0x245   :  { %v1159_v34 = vpop.f32.mrf.mxu0 }
 0x246   :  { %v1263_v12 = vadd.f32 %v1262_v11, %v1261_v7  ;;  %v1269_v1 = vrot.slane %v1268_v9, 1  ;;  %v1160_v19 = vadd.f32 %v1159_v34, %v924_v51 }
 0x247   :  { %v1161_v58 = vpop.f32.mrf.mxu0 }
 0x248   :  { %v1285_v17 = vmul.f32 0.0625, %v1263_v12  ;;  %v1270_v18 = vadd.f32 %v1269_v1, %v1268_v9  ;;  %v1162_v62 = vadd.f32 %v1161_v58, %v928_v52 }
 0x24a   :  { %v1289_v20 = vsub.f32 %v1077_v57, %v1285_v17  ;;  %v1293_v21 = vsub.f32 %v1083_v63, %v1285_v17  ;;  %v1286_v22 = vmul.f32 0.0625, %v1270_v18 }
 0x24c   :  { %v1297_v23 = vmul.f32 %v1289_v20, %v1289_v20  ;;  %v1301_v24 = vmul.f32 %v1293_v21, %v1293_v21  ;;  %v1290_v25 = vsub.f32 %v1079_v60, %v1286_v22  ;;  %v1294_v26 = vsub.f32 %v1085_v2, %v1286_v22 }
 0x24e   :  { %v1305_v27 = vadd.f32 %v1301_v24, %v1297_v23  ;;  %v1298_v28 = vmul.f32 %v1290_v25, %v1290_v25  ;;  %v1302_v29 = vmul.f32 %v1294_v26, %v1294_v26 }
 0x250   :  { %v1306_v31 = vrot.slane %v1305_v27, 4  ;;  %v1312_v33 = vadd.f32 %v1302_v29, %v1298_v28 }
 0x252   :  { %v1307_v35 = vadd.f32 %v1306_v31, %v1305_v27  ;;  %v1313_v36 = vrot.slane %v1312_v33, 4 }
 0x254   :  { %v1308_v38 = vrot.slane %v1307_v35, 2  ;;  %v1314_v39 = vadd.f32 %v1313_v36, %v1312_v33 }
 0x256   :  { %v1309_v40 = vadd.f32 %v1308_v38, %v1307_v35  ;;  %v1315_v41 = vrot.slane %v1314_v39, 2 }
 0x258   :  { %v1310_v42 = vrot.slane %v1309_v40, 1  ;;  %v1316_v43 = vadd.f32 %v1315_v41, %v1314_v39 }
 0x25a   :  { %v1311_v44 = vadd.f32 %v1310_v42, %v1309_v40  ;;  %v1317_v45 = vrot.slane %v1316_v43, 1 }
 0x25c   :  { %v1334_v46 = vsel %vm1333_vm1, %v1263_v12, %v1311_v44  ;;  %v1318_v47 = vadd.f32 %v1317_v45, %v1316_v43 }
 0x25d   :  { %v1339_v48 = vsel %vm1338_vm2, %v1334_v46, 0.0 }
 0x25e   :  { %v1335_v49 = vsel %vm1333_vm1, %v1270_v18, %v1318_v47  ;;  %1343 = vst [vmem:[#allocation13] sm:$0xff] %v1339_v48 }
 0x25f   :  { %v1340_v50 = vsel %vm1338_vm2, %v1335_v49, 0.0 }
 0x260   :  { %1344 = vst [vmem:[#allocation13 + $0x8] sm:$0xff] %v1340_v50 }
 0x273   :  { %v1230_v56 = vpop.f32.mrf.mxu1 }
 0x274   :  { %v1231_v57 = vadd.f32 %v1230_v56, %v1154_v3 }
 0x275   :  { %v1232_v59 = vpop.f32.mrf.mxu1 }
 0x276   :  { %1251 = vst [vmem:[#allocation11 + $0x10] sm:$0xff] %v1231_v57  ;;  %v1233_v60 = vadd.f32 %v1232_v59, %v1156_v16 }
 0x277   :  { %v1236_v61 = vpop.f32.mrf.mxu1 }
 0x278   :  { %1252 = vst [vmem:[#allocation11 + $0x18] sm:$0xff] %v1233_v60  ;;  %v1237_v32 = vadd.f32 %v1236_v61, %v1160_v19 }
 0x279   :  { %v1238_v63 = vpop.f32.mrf.mxu1 }
 0x27a   :  { %1255 = vst [vmem:[#allocation11 + $0x30] sm:$0xff] %v1237_v32  ;;  %v1271_v53 = vadd.f32 %v1237_v32, %v1231_v57  ;;  %v1239_v10 = vadd.f32 %v1238_v63, %v1162_v62 }
 0x27c   :  { %v1272_v13 = vrot.slane %v1271_v53, 4  ;;  %1256 = vst [vmem:[#allocation11 + $0x38] sm:$0xff] %v1239_v10  ;;  %v1278_v54 = vadd.f32 %v1239_v10, %v1233_v60 }
 0x27d   :  { %1519 = shalt.err (!%p1516_p1)
}
 0x27e   :  { %1370 = dma.vmem_to_hbm [thread:$0]  %s1365_s5, 1024, %s1760_s6, [#allocation12], %s1560_s29, %s1560_s29, %s1561_s30   ;;  %v1273_v0 = vadd.f32 %v1272_v13, %v1271_v53  ;;  %v1279_v2 = vrot.slane %v1278_v54, 4 }
 0x27f   :  { %s1566_s6 = smov [#allocation13]  }
 0x280   :  { %v1274_v4 = vrot.slane %v1273_v0, 2  ;;  %v1280_v55 = vadd.f32 %v1279_v2, %v1278_v54  ;;  %s1377_s29 = sshll.u32 %s1566_s6, 4  ;;  %s1378_s29 = int_to_ptr.vmem [resolvable:$true] %s1377_s29 }
 0x281   :  { %s1528_s30 = scalar_lea.vmem %s1378_s29, 512  ;;  %p1533_p3 = scmp.lt.s32.totalorder %s1378_s29, %s1378_s29 }
 0x282   :  { %v1275_v5 = vadd.f32 %v1274_v4, %v1273_v0  ;;  %v1281_v14 = vrot.slane %v1280_v55, 2  ;;  %p1529_p2 = scmp.ne.s32.totalorder %s1378_s29, %s1528_s30  ;;  %p1534_p4 = scmp.lt.s32.totalorder %s1528_s30, %s1528_s30 }
 0x284   :  { %v1276_v6 = vrot.slane %v1275_v5, 1  ;;  %v1282_v15 = vadd.f32 %v1281_v14, %v1280_v55  ;;  %p1535_p5 = por %p1534_p4, %p1533_p3 }
 0x286   :  { %v1277_v7 = vadd.f32 %v1276_v6, %v1275_v5  ;;  %v1283_v8 = vrot.slane %v1282_v15, 1  ;;  %p1536_p6 = pnand %p1535_p5, %p1529_p2 }
 0x288   :  { %v1287_v11 = vmul.f32 0.0625, %v1277_v7  ;;  %v1284_v9 = vadd.f32 %v1283_v8, %v1282_v15 }
 0x28a   :  { %v1291_v12 = vsub.f32 %v1231_v57, %v1287_v11  ;;  %v1295_v1 = vsub.f32 %v1237_v32, %v1287_v11  ;;  %v1288_v17 = vmul.f32 0.0625, %v1284_v9 }
 0x28c   :  { %v1299_v18 = vmul.f32 %v1291_v12, %v1291_v12  ;;  %v1303_v20 = vmul.f32 %v1295_v1, %v1295_v1  ;;  %v1292_v21 = vsub.f32 %v1233_v60, %v1288_v17  ;;  %v1296_v22 = vsub.f32 %v1239_v10, %v1288_v17 }
 0x28e   :  { %v1319_v23 = vadd.f32 %v1303_v20, %v1299_v18  ;;  %v1300_v24 = vmul.f32 %v1292_v21, %v1292_v21  ;;  %v1304_v25 = vmul.f32 %v1296_v22, %v1296_v22 }
 0x290   :  { %v1320_v26 = vrot.slane %v1319_v23, 4  ;;  %v1326_v27 = vadd.f32 %v1304_v25, %v1300_v24 }
 0x292   :  { %v1321_v28 = vadd.f32 %v1320_v26, %v1319_v23  ;;  %v1327_v29 = vrot.slane %v1326_v27, 4 }
 0x294   :  { %v1322_v31 = vrot.slane %v1321_v28, 2  ;;  %v1328_v33 = vadd.f32 %v1327_v29, %v1326_v27 }
 0x296   :  { %v1323_v35 = vadd.f32 %v1322_v31, %v1321_v28  ;;  %v1329_v36 = vrot.slane %v1328_v33, 2 }
 0x298   :  { %v1324_v38 = vrot.slane %v1323_v35, 1  ;;  %v1330_v39 = vadd.f32 %v1329_v36, %v1328_v33 }
 0x29a   :  { %v1325_v40 = vadd.f32 %v1324_v38, %v1323_v35  ;;  %v1331_v41 = vrot.slane %v1330_v39, 1 }
 0x29c   :  { %v1336_v42 = vsel %vm1333_vm1, %v1277_v7, %v1325_v40  ;;  %v1332_v43 = vadd.f32 %v1331_v41, %v1330_v39 }
 0x29d   :  { %v1341_v44 = vsel %vm1338_vm2, %v1336_v42, 0.0 }
 0x29e   :  { %v1337_v45 = vsel %vm1333_vm1, %v1284_v9, %v1332_v43  ;;  %1345 = vst [vmem:[#allocation13 + $0x10] sm:$0xff] %v1341_v44 }
 0x29f   :  { %v1342_v46 = vsel %vm1338_vm2, %v1337_v45, 0.0 }
 0x2a0   :  { %1346 = vst [vmem:[#allocation13 + $0x18] sm:$0xff] %v1342_v46 }
 0x2a1   :  { %1539 = shalt.err (!%p1536_p6)
}
 0x2a2   :  { %1380 = dma.vmem_to_hbm [thread:$0]  %s1378_s29, 512, %s1761_s7, [#allocation12]  }
 0x2a3   :  { %1554 = dma.done.wait [#allocation4], 1024  }
 0x2a4   :  { %1555 = vsyncadd [#allocation4], 4294966272 }
 0x2a5   :  { %1556 = dma.done.wait [#allocation12], 1536  }
 0x2a6   :  { %1557 = vsyncadd [#allocation12], 4294965760 }
 0x2a7   :  { %1390 = vsyncpa [#allocation3], 1 }
 0x2a8   :  { %1391 = vsyncpa [#allocation6], 1 }
 0x2a9   :  { %1392 = vsyncpa [#allocation9], 1 }
 0x2aa   :  { %1393 = vsyncpa [#allocation4], 1 }
 0x2ab   :  { %1394 = vsyncpa [#allocation12], 1 }

</bundles_post_ra>
